<compile_context>
chip_gen: v7x
topology: tpu7x:2x2x1
jax: 0.10.0
libtpu: 0.0.40
codegen_flags: <defaults>
</compile_context>

<pallas_src>
import functools

import jax
import jax.numpy as jnp
from jax.experimental import pallas as pl
from jax.experimental.pallas import tpu as pltpu


NUM_NODE_TYPES = 8
NODE_DIM = 32
EDGE_DIM = 32
OUTPUT_DIM = 1
NUM_ENC_LAYERS = 2


# ----------------------------------------------------------------------------
# Fused Pallas kernel: embedders -> encoder layers -> pooling -> final MLP
# (all activations are feature-major: (features, entities))
# ----------------------------------------------------------------------------
def _fused_forward_kernel(*refs, num_layers, node_dim, edge_dim):
    assert len(refs) == 7 + 7 * num_layers + 5 + 1
    (onehot_ref, gs_ref, gd_ref, dist_ref, mask_n_ref, mask_e_ref,
     w_emb_ref) = refs[:7]
    layer_refs = refs[7:7 + 7 * num_layers]
    (w1a_ref, w1b_ref, b1_ref, w2_ref, b2_ref) = refs[7 + 7 * num_layers:-1]
    o_ref = refs[-1]

    f32, bf16 = jnp.float32, jnp.bfloat16

    def dot_nn(a, b):       # (M, K) @ (K, N) -> (M, N), f32 accumulation on MXU
        return jax.lax.dot_general(a, b, (((1,), (0,)), ((), ())),
                                   preferred_element_type=f32)

    def dot_nt(a, b):       # (M, K) @ (N, K)^T -> (M, N), f32 accumulation
        return jax.lax.dot_general(a, b, (((1,), (1,)), ((), ())),
                                   preferred_element_type=f32)

    gs = gs_ref[...]        # (E, N) bf16, one-hot rows of src
    gd = gd_ref[...]        # (E, N) bf16, one-hot rows of dst
    dist = dist_ref[...]    # (1, E) f32

    # --- embedders: one fused (node_dim + 2*edge_dim, num_node_types) matmul.
    emb = dot_nn(w_emb_ref[...], onehot_ref[...])                     # (nd+2ed, N) f32
    h_node = emb[:node_dim, :]                                        # (nd, N) f32
    h_edge = (dot_nt(emb[node_dim:node_dim + edge_dim, :].astype(bf16), gs) +
              dot_nt(emb[node_dim + edge_dim:, :].astype(bf16), gd))  # (ed, E) f32

    # --- encoder layers (num_timesteps == 0 -> zero time features dropped).
    for l in range(num_layers):
        (w_sd_ref, w_edge_ref, w_dist_ref, b_edge_ref,
         w_node_ref, w_agg_ref, b_node_ref) = layer_refs[7 * l:7 * (l + 1)]

        h_node_b = h_node.astype(bf16)
        # projection-before-gather: one 2*edge_dim-wide matmul over N nodes,
        # then gather the two halves onto edges with NT matmuls.
        p = dot_nn(w_sd_ref[...], h_node_b).astype(bf16)              # (2*ed, N)
        m = (dot_nt(p[:edge_dim, :], gs) +                            # src gather (ed, E)
             dot_nt(p[edge_dim:, :], gd) +                            # dst gather (ed, E)
             dot_nn(w_edge_ref[...], h_edge.astype(bf16)) +
             w_dist_ref[...] * dist +                                 # (ed,1)*(1,E)
             b_edge_ref[...])
        m = jnp.maximum(m, 0.0)                                       # (ed, E) f32
        h_edge = h_edge + m

        # scatter-add over dst = plain NN matmul with gather_dst as the RHS.
        agg = dot_nn(m.astype(bf16), gd)                              # (ed, N) f32
        u = (dot_nn(w_node_ref[...], h_node_b) +
             dot_nn(w_agg_ref[...], agg.astype(bf16)) +
             b_node_ref[...])
        h_node = h_node + jnp.maximum(u, 0.0)                         # (nd, N) f32

    # --- per-graph mean pooling (masks pre-scaled by 1/count) and final MLP.
    pooled_n = dot_nt(h_node.astype(bf16), mask_n_ref[...])           # (nd, G) f32
    pooled_e = dot_nt(h_edge.astype(bf16), mask_e_ref[...])           # (ed, G) f32
    h = (dot_nn(w1a_ref[...], pooled_n.astype(bf16)) +
         dot_nn(w1b_ref[...], pooled_e.astype(bf16)) + b1_ref[...])   # (nd+ed, G)
    h = jnp.maximum(h, 0.0)
    pred = dot_nn(w2_ref[...], h.astype(bf16)) + b2_ref[...]          # (out, G) f32
    o_ref[...] = pred.astype(o_ref.dtype)


# ----------------------------------------------------------------------------
# Parameter construction (deterministic, synthetic) and packing for the kernel
# ----------------------------------------------------------------------------
def init_params(key):
    def w(k, shape, scale=0.1):
        return scale * jax.random.normal(k, shape, dtype=jnp.float32)

    keys = jax.random.split(key, 20)
    params = {
        # nn.Linear(num_node_types, node_dim, bias=False), stored (in, out)
        "node_emb_w": w(keys[0], (NUM_NODE_TYPES, NODE_DIM)),
        # nn.Linear(num_node_types*2, edge_dim, bias=False), split into src/dst halves
        "edge_emb_w_src": w(keys[1], (NUM_NODE_TYPES, EDGE_DIM)),
        "edge_emb_w_dst": w(keys[2], (NUM_NODE_TYPES, EDGE_DIM)),
        "encoder": [],
        # final MLP(node_dim+edge_dim -> node_dim+edge_dim -> output_dim), W1 split
        "final_w1a": w(keys[3], (NODE_DIM, NODE_DIM + EDGE_DIM)),
        "final_w1b": w(keys[4], (EDGE_DIM, NODE_DIM + EDGE_DIM)),
        "final_b1": jnp.zeros((1, NODE_DIM + EDGE_DIM), jnp.float32),
        "final_w2": w(keys[5], (NODE_DIM + EDGE_DIM, OUTPUT_DIM)),
        "final_b2": jnp.zeros((1, OUTPUT_DIM), jnp.float32),
    }
    for l in range(NUM_ENC_LAYERS):
        k = keys[6 + 6 * l: 12 + 6 * l]
        params["encoder"].append({
            # edge update weight, sliced over [h_src | h_dst | h_edge | dist]
            "w_src": w(k[0], (NODE_DIM, EDGE_DIM)),
            "w_dst": w(k[1], (NODE_DIM, EDGE_DIM)),
            "w_edge": w(k[2], (EDGE_DIM, EDGE_DIM)),
            "w_dist": w(k[3], (1, EDGE_DIM)),
            "b_edge": jnp.zeros((1, EDGE_DIM), jnp.float32),
            # node update weight, sliced over [h_node | agg]
            "w_node": w(k[4], (NODE_DIM, NODE_DIM)),
            "w_agg": w(k[5], (EDGE_DIM, NODE_DIM)),
            "b_node": jnp.zeros((1, NODE_DIM), jnp.float32),
        })
    return params


def pack_params(params):
    """Transpose to feature-major, stack small weights, cast matmul weights to bf16."""
    bf16, f32 = jnp.bfloat16, jnp.float32
    layers = []
    for layer in params["encoder"]:
        layers.append(dict(
            w_sd=jnp.concatenate([layer["w_src"], layer["w_dst"]],
                                 axis=1).T.astype(bf16),       # (2*ed, nd)
            w_edge=layer["w_edge"].T.astype(bf16),              # (ed, ed)
            w_dist=layer["w_dist"].T.astype(f32),               # (ed, 1)
            b_edge=layer["b_edge"].T.astype(f32),               # (ed, 1)
            w_node=layer["w_node"].T.astype(bf16),              # (nd, nd)
            w_agg=layer["w_agg"].T.astype(bf16),                # (nd, ed)
            b_node=layer["b_node"].T.astype(f32),               # (nd, 1)
        ))
    return dict(
        w_emb=jnp.concatenate([params["node_emb_w"], params["edge_emb_w_src"],
                               params["edge_emb_w_dst"]],
                              axis=1).T.astype(bf16),           # (nd+2ed, types)
        layers=layers,
        w1a=params["final_w1a"].T.astype(bf16),                 # (nd+ed, nd)
        w1b=params["final_w1b"].T.astype(bf16),                 # (nd+ed, ed)
        b1=params["final_b1"].T.astype(f32),                    # (nd+ed, 1)
        w2=params["final_w2"].T.astype(bf16),                   # (out, nd+ed)
        b2=params["final_b2"].T.astype(f32),                    # (out, 1)
    )


# ----------------------------------------------------------------------------
# Graph-structure matrices (plain JAX glue; exact 0/1 entries in bf16)
# ----------------------------------------------------------------------------
def build_graph_structs(h_node_onehot, pos_node, batch_node, edge_index,
                        batch_edge, num_graphs):
    # TODO(synk): if the graph structure is static across calls, cache these
    # outputs instead of rebuilding each forward.
    N = h_node_onehot.shape[0]
    src, dst = edge_index[0], edge_index[1]
    node_ids = jnp.arange(N)
    gather_src = (src[:, None] == node_ids[None, :]).astype(jnp.bfloat16)   # (E, N)
    gather_dst = (dst[:, None] == node_ids[None, :]).astype(jnp.bfloat16)   # (E, N)

    rel = jnp.take(pos_node, dst, axis=0) - jnp.take(pos_node, src, axis=0)
    dist = jnp.sqrt(jnp.sum(rel * rel, axis=-1) + 1e-12)[None, :]           # (1, E) f32

    graph_ids = jnp.arange(num_graphs)
    mask_node = (batch_node[None, :] == graph_ids[:, None]).astype(jnp.float32)  # (G, N)
    mask_edge = (batch_edge[None, :] == graph_ids[:, None]).astype(jnp.float32)  # (G, E)
    # mean pooling folded into the masks (pre-scaled by 1/count), then bf16.
    mask_node = (mask_node / jnp.maximum(mask_node.sum(1, keepdims=True), 1.0)
                 ).astype(jnp.bfloat16)
    mask_edge = (mask_edge / jnp.maximum(mask_edge.sum(1, keepdims=True), 1.0)
                 ).astype(jnp.bfloat16)

    onehot_t = h_node_onehot.T.astype(jnp.bfloat16)                          # (types, N)
    return onehot_t, gather_src, gather_dst, dist, mask_node, mask_edge


# ----------------------------------------------------------------------------
# Forward pass (matches PropertyPredictor.forward with num_timesteps == 0)
# ----------------------------------------------------------------------------
def property_predictor_forward(params, h_node_onehot, pos_node, batch_node,
                               edge_index, batch_edge, num_graphs):
    G = num_graphs
    structs = build_graph_structs(h_node_onehot, pos_node, batch_node,
                                  edge_index, batch_edge, G)
    packed = pack_params(params)

    inputs = list(structs) + [packed["w_emb"]]
    for layer in packed["layers"]:
        inputs += [layer["w_sd"], layer["w_edge"], layer["w_dist"], layer["b_edge"],
                   layer["w_node"], layer["w_agg"], layer["b_node"]]
    inputs += [packed["w1a"], packed["w1b"], packed["b1"], packed["w2"], packed["b2"]]

    def full_spec(shape):
        return pl.BlockSpec(shape, lambda i: (0,) * len(shape))   # single full block

    kernel = functools.partial(_fused_forward_kernel,
                               num_layers=len(packed["layers"]),
                               node_dim=NODE_DIM, edge_dim=EDGE_DIM)
    pred_t = pl.pallas_call(
        kernel,
        out_shape=jax.ShapeDtypeStruct((OUTPUT_DIM, G), jnp.float32),
        grid=(1,),
        in_specs=[full_spec(x.shape) for x in inputs],
        out_specs=full_spec((OUTPUT_DIM, G)),
        compiler_params=pltpu.CompilerParams(
            dimension_semantics=("arbitrary",),
            vmem_limit_bytes=32 * 1024 * 1024),
    )(*inputs)
    return pred_t.T                                               # (G, OUTPUT_DIM)


# ----------------------------------------------------------------------------
# Main
# ----------------------------------------------------------------------------
if __name__ == "__main__":
    key = jax.random.PRNGKey(0)
    k_param, k_type, k_src, k_dst, k_pos = jax.random.split(key, 5)

    params = init_params(k_param)

    # Small synthetic graph batch: 2 graphs, 8 nodes each, 12 halfedges each.
    N_PER_G, HE_PER_G, G = 8, 12, 2
    N = N_PER_G * G
    node_type = jax.random.randint(k_type, (N,), 0, NUM_NODE_TYPES)
    h_node_onehot = jax.nn.one_hot(node_type, NUM_NODE_TYPES, dtype=jnp.float32)
    pos_node = jax.random.normal(k_pos, (N, 3), dtype=jnp.float32)
    batch_node = jnp.repeat(jnp.arange(G), N_PER_G)                       # (N,)

    # halfedges within each graph
    src_local = jax.random.randint(k_src, (G, HE_PER_G), 0, N_PER_G)
    dst_local = jax.random.randint(k_dst, (G, HE_PER_G), 0, N_PER_G)
    offsets = (jnp.arange(G) * N_PER_G)[:, None]
    halfedge_index = jnp.stack([(src_local + offsets).reshape(-1),
                                (dst_local + offsets).reshape(-1)], axis=0)  # (2, 24)
    batch_halfedge = jnp.repeat(jnp.arange(G), HE_PER_G)                     # (24,)

    # edge_index = cat([halfedge_index, halfedge_index.flip(0)], dim=1)
    edge_index = jnp.concatenate([halfedge_index, halfedge_index[::-1]], axis=1)  # (2, 48)
    batch_edge = jnp.concatenate([batch_halfedge, batch_halfedge], axis=0)        # (48,)

    pred = property_predictor_forward(params, h_node_onehot, pos_node, batch_node,
                                      edge_index, batch_edge, G)
    pred = jax.block_until_ready(pred)
    assert pred.shape == (G, OUTPUT_DIM)
    assert bool(jnp.all(jnp.isfinite(pred)))
    print("KERNEL_OK")
</pallas_src>

<mosaic_0001>
module attributes {stable_mosaic.version = 11 : i64} {
  func.func @_fused_forward_kernel(%arg0: i32, %arg1: memref<8x16xbf16, #tpu.memory_space<vmem>>, %arg2: memref<48x16xbf16, #tpu.memory_space<vmem>>, %arg3: memref<48x16xbf16, #tpu.memory_space<vmem>>, %arg4: memref<1x48xf32, #tpu.memory_space<vmem>>, %arg5: memref<2x16xbf16, #tpu.memory_space<vmem>>, %arg6: memref<2x48xbf16, #tpu.memory_space<vmem>>, %arg7: memref<96x8xbf16, #tpu.memory_space<vmem>>, %arg8: memref<64x32xbf16, #tpu.memory_space<vmem>>, %arg9: memref<32x32xbf16, #tpu.memory_space<vmem>>, %arg10: memref<32x1xf32, #tpu.memory_space<vmem>>, %arg11: memref<32x1xf32, #tpu.memory_space<vmem>>, %arg12: memref<32x32xbf16, #tpu.memory_space<vmem>>, %arg13: memref<32x32xbf16, #tpu.memory_space<vmem>>, %arg14: memref<32x1xf32, #tpu.memory_space<vmem>>, %arg15: memref<64x32xbf16, #tpu.memory_space<vmem>>, %arg16: memref<32x32xbf16, #tpu.memory_space<vmem>>, %arg17: memref<32x1xf32, #tpu.memory_space<vmem>>, %arg18: memref<32x1xf32, #tpu.memory_space<vmem>>, %arg19: memref<32x32xbf16, #tpu.memory_space<vmem>>, %arg20: memref<32x32xbf16, #tpu.memory_space<vmem>>, %arg21: memref<32x1xf32, #tpu.memory_space<vmem>>, %arg22: memref<64x32xbf16, #tpu.memory_space<vmem>>, %arg23: memref<64x32xbf16, #tpu.memory_space<vmem>>, %arg24: memref<64x1xf32, #tpu.memory_space<vmem>>, %arg25: memref<1x64xbf16, #tpu.memory_space<vmem>>, %arg26: memref<1x1xf32, #tpu.memory_space<vmem>>, %arg27: memref<1x2xf32, #tpu.memory_space<vmem>>) attributes {dimension_semantics = [#tpu.dimension_semantics<arbitrary>], iteration_bounds = array<i64: 1>, scalar_prefetch = 0 : i64, scratch_operands = 0 : i64, tpu.core_type = #tpu.core_type<tc>, window_params = [{pipeline_mode = #tpu.pipeline_mode<synchronous>, transform_indices = @transform_0, window_bounds = array<i64: 8, 16>}, {pipeline_mode = #tpu.pipeline_mode<synchronous>, transform_indices = @transform_1, window_bounds = array<i64: 48, 16>}, {pipeline_mode = #tpu.pipeline_mode<synchronous>, transform_indices = @transform_2, window_bounds = array<i64: 48, 16>}, {pipeline_mode = #tpu.pipeline_mode<synchronous>, transform_indices = @transform_3, window_bounds = array<i64: 1, 48>}, {pipeline_mode = #tpu.pipeline_mode<synchronous>, transform_indices = @transform_4, window_bounds = array<i64: 2, 16>}, {pipeline_mode = #tpu.pipeline_mode<synchronous>, transform_indices = @transform_5, window_bounds = array<i64: 2, 48>}, {pipeline_mode = #tpu.pipeline_mode<synchronous>, transform_indices = @transform_6, window_bounds = array<i64: 96, 8>}, {pipeline_mode = #tpu.pipeline_mode<synchronous>, transform_indices = @transform_7, window_bounds = array<i64: 64, 32>}, {pipeline_mode = #tpu.pipeline_mode<synchronous>, transform_indices = @transform_8, window_bounds = array<i64: 32, 32>}, {pipeline_mode = #tpu.pipeline_mode<synchronous>, transform_indices = @transform_9, window_bounds = array<i64: 32, 1>}, {pipeline_mode = #tpu.pipeline_mode<synchronous>, transform_indices = @transform_10, window_bounds = array<i64: 32, 1>}, {pipeline_mode = #tpu.pipeline_mode<synchronous>, transform_indices = @transform_11, window_bounds = array<i64: 32, 32>}, {pipeline_mode = #tpu.pipeline_mode<synchronous>, transform_indices = @transform_12, window_bounds = array<i64: 32, 32>}, {pipeline_mode = #tpu.pipeline_mode<synchronous>, transform_indices = @transform_13, window_bounds = array<i64: 32, 1>}, {pipeline_mode = #tpu.pipeline_mode<synchronous>, transform_indices = @transform_14, window_bounds = array<i64: 64, 32>}, {pipeline_mode = #tpu.pipeline_mode<synchronous>, transform_indices = @transform_15, window_bounds = array<i64: 32, 32>}, {pipeline_mode = #tpu.pipeline_mode<synchronous>, transform_indices = @transform_16, window_bounds = array<i64: 32, 1>}, {pipeline_mode = #tpu.pipeline_mode<synchronous>, transform_indices = @transform_17, window_bounds = array<i64: 32, 1>}, {pipeline_mode = #tpu.pipeline_mode<synchronous>, transform_indices = @transform_18, window_bounds = array<i64: 32, 32>}, {pipeline_mode = #tpu.pipeline_mode<synchronous>, transform_indices = @transform_19, window_bounds = array<i64: 32, 32>}, {pipeline_mode = #tpu.pipeline_mode<synchronous>, transform_indices = @transform_20, window_bounds = array<i64: 32, 1>}, {pipeline_mode = #tpu.pipeline_mode<synchronous>, transform_indices = @transform_21, window_bounds = array<i64: 64, 32>}, {pipeline_mode = #tpu.pipeline_mode<synchronous>, transform_indices = @transform_22, window_bounds = array<i64: 64, 32>}, {pipeline_mode = #tpu.pipeline_mode<synchronous>, transform_indices = @transform_23, window_bounds = array<i64: 64, 1>}, {pipeline_mode = #tpu.pipeline_mode<synchronous>, transform_indices = @transform_24, window_bounds = array<i64: 1, 64>}, {pipeline_mode = #tpu.pipeline_mode<synchronous>, transform_indices = @transform_25, window_bounds = array<i64: 1, 1>}, {pipeline_mode = #tpu.pipeline_mode<synchronous>, transform_indices = @transform_26, window_bounds = array<i64: 1, 2>}]} {
    %c0 = arith.constant 0 : index
    %c0_0 = arith.constant 0 : index
    %0 = vector.load %arg2[%c0, %c0_0] : memref<48x16xbf16, #tpu.memory_space<vmem>>, vector<48x16xbf16>
    %c0_1 = arith.constant 0 : index
    %c0_2 = arith.constant 0 : index
    %1 = vector.load %arg3[%c0_1, %c0_2] : memref<48x16xbf16, #tpu.memory_space<vmem>>, vector<48x16xbf16>
    %c0_3 = arith.constant 0 : index
    %c0_4 = arith.constant 0 : index
    %2 = vector.load %arg4[%c0_3, %c0_4] : memref<1x48xf32, #tpu.memory_space<vmem>>, vector<1x48xf32>
    %c0_5 = arith.constant 0 : index
    %c0_6 = arith.constant 0 : index
    %3 = vector.load %arg7[%c0_5, %c0_6] : memref<96x8xbf16, #tpu.memory_space<vmem>>, vector<96x8xbf16>
    %c0_7 = arith.constant 0 : index
    %c0_8 = arith.constant 0 : index
    %4 = vector.load %arg1[%c0_7, %c0_8] : memref<8x16xbf16, #tpu.memory_space<vmem>>, vector<8x16xbf16>
    %cst = arith.constant dense<0.000000e+00> : vector<96x16xf32>
    %5 = tpu.matmul %3, %4, %cst {dimension_numbers = #tpu.dot_dimension_numbers<[1], [0], [0], [1], [0, 0, 1, 1], [], []>} : vector<96x8xbf16>, vector<8x16xbf16>, vector<96x16xf32> -> vector<96x16xf32>
    %6 = vector.extract_strided_slice %5 {offsets = [0, 0], sizes = [32, 16], strides = [1, 1]} : vector<96x16xf32> to vector<32x16xf32>
    %7 = vector.extract_strided_slice %5 {offsets = [32, 0], sizes = [32, 16], strides = [1, 1]} : vector<96x16xf32> to vector<32x16xf32>
    %8 = arith.truncf %7 : vector<32x16xf32> to vector<32x16xbf16>
    %cst_9 = arith.constant dense<0.000000e+00> : vector<32x48xf32>
    %9 = tpu.matmul %8, %0, %cst_9 {dimension_numbers = #tpu.dot_dimension_numbers<[1], [1], [0], [0], [0, 0, 1, 0], [], []>} : vector<32x16xbf16>, vector<48x16xbf16>, vector<32x48xf32> -> vector<32x48xf32>
    %10 = vector.extract_strided_slice %5 {offsets = [64, 0], sizes = [32, 16], strides = [1, 1]} : vector<96x16xf32> to vector<32x16xf32>
    %11 = arith.truncf %10 : vector<32x16xf32> to vector<32x16xbf16>
    %cst_10 = arith.constant dense<0.000000e+00> : vector<32x48xf32>
    %12 = tpu.matmul %11, %1, %cst_10 {dimension_numbers = #tpu.dot_dimension_numbers<[1], [1], [0], [0], [0, 0, 1, 0], [], []>} : vector<32x16xbf16>, vector<48x16xbf16>, vector<32x48xf32> -> vector<32x48xf32>
    %13 = arith.addf %9, %12 : vector<32x48xf32>
    %14 = arith.truncf %6 : vector<32x16xf32> to vector<32x16xbf16>
    %c0_11 = arith.constant 0 : index
    %c0_12 = arith.constant 0 : index
    %15 = vector.load %arg8[%c0_11, %c0_12] : memref<64x32xbf16, #tpu.memory_space<vmem>>, vector<64x32xbf16>
    %cst_13 = arith.constant dense<0.000000e+00> : vector<64x16xf32>
    %16 = tpu.matmul %15, %14, %cst_13 {dimension_numbers = #tpu.dot_dimension_numbers<[1], [0], [0], [1], [0, 0, 1, 1], [], []>} : vector<64x32xbf16>, vector<32x16xbf16>, vector<64x16xf32> -> vector<64x16xf32>
    %17 = arith.truncf %16 : vector<64x16xf32> to vector<64x16xbf16>
    %18 = vector.extract_strided_slice %17 {offsets = [0, 0], sizes = [32, 16], strides = [1, 1]} : vector<64x16xbf16> to vector<32x16xbf16>
    %cst_14 = arith.constant dense<0.000000e+00> : vector<32x48xf32>
    %19 = tpu.matmul %18, %0, %cst_14 {dimension_numbers = #tpu.dot_dimension_numbers<[1], [1], [0], [0], [0, 0, 1, 0], [], []>} : vector<32x16xbf16>, vector<48x16xbf16>, vector<32x48xf32> -> vector<32x48xf32>
    %20 = vector.extract_strided_slice %17 {offsets = [32, 0], sizes = [32, 16], strides = [1, 1]} : vector<64x16xbf16> to vector<32x16xbf16>
    %cst_15 = arith.constant dense<0.000000e+00> : vector<32x48xf32>
    %21 = tpu.matmul %20, %1, %cst_15 {dimension_numbers = #tpu.dot_dimension_numbers<[1], [1], [0], [0], [0, 0, 1, 0], [], []>} : vector<32x16xbf16>, vector<48x16xbf16>, vector<32x48xf32> -> vector<32x48xf32>
    %22 = arith.addf %19, %21 : vector<32x48xf32>
    %c0_16 = arith.constant 0 : index
    %c0_17 = arith.constant 0 : index
    %23 = vector.load %arg9[%c0_16, %c0_17] : memref<32x32xbf16, #tpu.memory_space<vmem>>, vector<32x32xbf16>
    %24 = arith.truncf %13 : vector<32x48xf32> to vector<32x48xbf16>
    %cst_18 = arith.constant dense<0.000000e+00> : vector<32x48xf32>
    %25 = tpu.matmul %23, %24, %cst_18 {dimension_numbers = #tpu.dot_dimension_numbers<[1], [0], [0], [1], [0, 0, 1, 1], [], []>} : vector<32x32xbf16>, vector<32x48xbf16>, vector<32x48xf32> -> vector<32x48xf32>
    %26 = arith.addf %22, %25 : vector<32x48xf32>
    %c0_19 = arith.constant 0 : index
    %c0_20 = arith.constant 0 : index
    %27 = vector.load %arg10[%c0_19, %c0_20] : memref<32x1xf32, #tpu.memory_space<vmem>>, vector<32x1xf32>
    %28 = vector.broadcast %27 : vector<32x1xf32> to vector<32x48xf32>
    %29 = vector.broadcast %2 : vector<1x48xf32> to vector<32x48xf32>
    %30 = arith.mulf %28, %29 : vector<32x48xf32>
    %31 = arith.addf %26, %30 : vector<32x48xf32>
    %c0_21 = arith.constant 0 : index
    %c0_22 = arith.constant 0 : index
    %32 = vector.load %arg11[%c0_21, %c0_22] : memref<32x1xf32, #tpu.memory_space<vmem>>, vector<32x1xf32>
    %33 = vector.broadcast %32 : vector<32x1xf32> to vector<32x48xf32>
    %34 = arith.addf %31, %33 : vector<32x48xf32>
    %cst_23 = arith.constant 0.000000e+00 : f32
    %35 = vector.broadcast %cst_23 : f32 to vector<32x48xf32>
    %36 = arith.maximumf %34, %35 : vector<32x48xf32>
    %37 = arith.addf %13, %36 : vector<32x48xf32>
    %38 = arith.truncf %36 : vector<32x48xf32> to vector<32x48xbf16>
    %cst_24 = arith.constant dense<0.000000e+00> : vector<32x16xf32>
    %39 = tpu.matmul %38, %1, %cst_24 {dimension_numbers = #tpu.dot_dimension_numbers<[1], [0], [0], [1], [0, 0, 1, 1], [], []>} : vector<32x48xbf16>, vector<48x16xbf16>, vector<32x16xf32> -> vector<32x16xf32>
    %c0_25 = arith.constant 0 : index
    %c0_26 = arith.constant 0 : index
    %40 = vector.load %arg12[%c0_25, %c0_26] : memref<32x32xbf16, #tpu.memory_space<vmem>>, vector<32x32xbf16>
    %cst_27 = arith.constant dense<0.000000e+00> : vector<32x16xf32>
    %41 = tpu.matmul %40, %14, %cst_27 {dimension_numbers = #tpu.dot_dimension_numbers<[1], [0], [0], [1], [0, 0, 1, 1], [], []>} : vector<32x32xbf16>, vector<32x16xbf16>, vector<32x16xf32> -> vector<32x16xf32>
    %c0_28 = arith.constant 0 : index
    %c0_29 = arith.constant 0 : index
    %42 = vector.load %arg13[%c0_28, %c0_29] : memref<32x32xbf16, #tpu.memory_space<vmem>>, vector<32x32xbf16>
    %43 = arith.truncf %39 : vector<32x16xf32> to vector<32x16xbf16>
    %cst_30 = arith.constant dense<0.000000e+00> : vector<32x16xf32>
    %44 = tpu.matmul %42, %43, %cst_30 {dimension_numbers = #tpu.dot_dimension_numbers<[1], [0], [0], [1], [0, 0, 1, 1], [], []>} : vector<32x32xbf16>, vector<32x16xbf16>, vector<32x16xf32> -> vector<32x16xf32>
    %45 = arith.addf %41, %44 : vector<32x16xf32>
    %c0_31 = arith.constant 0 : index
    %c0_32 = arith.constant 0 : index
    %46 = vector.load %arg14[%c0_31, %c0_32] : memref<32x1xf32, #tpu.memory_space<vmem>>, vector<32x1xf32>
    %47 = vector.broadcast %46 : vector<32x1xf32> to vector<32x16xf32>
    %48 = arith.addf %45, %47 : vector<32x16xf32>
    %cst_33 = arith.constant 0.000000e+00 : f32
    %49 = vector.broadcast %cst_33 : f32 to vector<32x16xf32>
    %50 = arith.maximumf %48, %49 : vector<32x16xf32>
    %51 = arith.addf %6, %50 : vector<32x16xf32>
    %52 = arith.truncf %51 : vector<32x16xf32> to vector<32x16xbf16>
    %c0_34 = arith.constant 0 : index
    %c0_35 = arith.constant 0 : index
    %53 = vector.load %arg15[%c0_34, %c0_35] : memref<64x32xbf16, #tpu.memory_space<vmem>>, vector<64x32xbf16>
    %cst_36 = arith.constant dense<0.000000e+00> : vector<64x16xf32>
    %54 = tpu.matmul %53, %52, %cst_36 {dimension_numbers = #tpu.dot_dimension_numbers<[1], [0], [0], [1], [0, 0, 1, 1], [], []>} : vector<64x32xbf16>, vector<32x16xbf16>, vector<64x16xf32> -> vector<64x16xf32>
    %55 = arith.truncf %54 : vector<64x16xf32> to vector<64x16xbf16>
    %56 = vector.extract_strided_slice %55 {offsets = [0, 0], sizes = [32, 16], strides = [1, 1]} : vector<64x16xbf16> to vector<32x16xbf16>
    %cst_37 = arith.constant dense<0.000000e+00> : vector<32x48xf32>
    %57 = tpu.matmul %56, %0, %cst_37 {dimension_numbers = #tpu.dot_dimension_numbers<[1], [1], [0], [0], [0, 0, 1, 0], [], []>} : vector<32x16xbf16>, vector<48x16xbf16>, vector<32x48xf32> -> vector<32x48xf32>
    %58 = vector.extract_strided_slice %55 {offsets = [32, 0], sizes = [32, 16], strides = [1, 1]} : vector<64x16xbf16> to vector<32x16xbf16>
    %cst_38 = arith.constant dense<0.000000e+00> : vector<32x48xf32>
    %59 = tpu.matmul %58, %1, %cst_38 {dimension_numbers = #tpu.dot_dimension_numbers<[1], [1], [0], [0], [0, 0, 1, 0], [], []>} : vector<32x16xbf16>, vector<48x16xbf16>, vector<32x48xf32> -> vector<32x48xf32>
    %60 = arith.addf %57, %59 : vector<32x48xf32>
    %c0_39 = arith.constant 0 : index
    %c0_40 = arith.constant 0 : index
    %61 = vector.load %arg16[%c0_39, %c0_40] : memref<32x32xbf16, #tpu.memory_space<vmem>>, vector<32x32xbf16>
    %62 = arith.truncf %37 : vector<32x48xf32> to vector<32x48xbf16>
    %cst_41 = arith.constant dense<0.000000e+00> : vector<32x48xf32>
    %63 = tpu.matmul %61, %62, %cst_41 {dimension_numbers = #tpu.dot_dimension_numbers<[1], [0], [0], [1], [0, 0, 1, 1], [], []>} : vector<32x32xbf16>, vector<32x48xbf16>, vector<32x48xf32> -> vector<32x48xf32>
    %64 = arith.addf %60, %63 : vector<32x48xf32>
    %c0_42 = arith.constant 0 : index
    %c0_43 = arith.constant 0 : index
    %65 = vector.load %arg17[%c0_42, %c0_43] : memref<32x1xf32, #tpu.memory_space<vmem>>, vector<32x1xf32>
    %66 = vector.broadcast %65 : vector<32x1xf32> to vector<32x48xf32>
    %67 = vector.broadcast %2 : vector<1x48xf32> to vector<32x48xf32>
    %68 = arith.mulf %66, %67 : vector<32x48xf32>
    %69 = arith.addf %64, %68 : vector<32x48xf32>
    %c0_44 = arith.constant 0 : index
    %c0_45 = arith.constant 0 : index
    %70 = vector.load %arg18[%c0_44, %c0_45] : memref<32x1xf32, #tpu.memory_space<vmem>>, vector<32x1xf32>
    %71 = vector.broadcast %70 : vector<32x1xf32> to vector<32x48xf32>
    %72 = arith.addf %69, %71 : vector<32x48xf32>
    %cst_46 = arith.constant 0.000000e+00 : f32
    %73 = vector.broadcast %cst_46 : f32 to vector<32x48xf32>
    %74 = arith.maximumf %72, %73 : vector<32x48xf32>
    %75 = arith.addf %37, %74 : vector<32x48xf32>
    %76 = arith.truncf %74 : vector<32x48xf32> to vector<32x48xbf16>
    %cst_47 = arith.constant dense<0.000000e+00> : vector<32x16xf32>
    %77 = tpu.matmul %76, %1, %cst_47 {dimension_numbers = #tpu.dot_dimension_numbers<[1], [0], [0], [1], [0, 0, 1, 1], [], []>} : vector<32x48xbf16>, vector<48x16xbf16>, vector<32x16xf32> -> vector<32x16xf32>
    %c0_48 = arith.constant 0 : index
    %c0_49 = arith.constant 0 : index
    %78 = vector.load %arg19[%c0_48, %c0_49] : memref<32x32xbf16, #tpu.memory_space<vmem>>, vector<32x32xbf16>
    %cst_50 = arith.constant dense<0.000000e+00> : vector<32x16xf32>
    %79 = tpu.matmul %78, %52, %cst_50 {dimension_numbers = #tpu.dot_dimension_numbers<[1], [0], [0], [1], [0, 0, 1, 1], [], []>} : vector<32x32xbf16>, vector<32x16xbf16>, vector<32x16xf32> -> vector<32x16xf32>
    %c0_51 = arith.constant 0 : index
    %c0_52 = arith.constant 0 : index
    %80 = vector.load %arg20[%c0_51, %c0_52] : memref<32x32xbf16, #tpu.memory_space<vmem>>, vector<32x32xbf16>
    %81 = arith.truncf %77 : vector<32x16xf32> to vector<32x16xbf16>
    %cst_53 = arith.constant dense<0.000000e+00> : vector<32x16xf32>
    %82 = tpu.matmul %80, %81, %cst_53 {dimension_numbers = #tpu.dot_dimension_numbers<[1], [0], [0], [1], [0, 0, 1, 1], [], []>} : vector<32x32xbf16>, vector<32x16xbf16>, vector<32x16xf32> -> vector<32x16xf32>
    %83 = arith.addf %79, %82 : vector<32x16xf32>
    %c0_54 = arith.constant 0 : index
    %c0_55 = arith.constant 0 : index
    %84 = vector.load %arg21[%c0_54, %c0_55] : memref<32x1xf32, #tpu.memory_space<vmem>>, vector<32x1xf32>
    %85 = vector.broadcast %84 : vector<32x1xf32> to vector<32x16xf32>
    %86 = arith.addf %83, %85 : vector<32x16xf32>
    %cst_56 = arith.constant 0.000000e+00 : f32
    %87 = vector.broadcast %cst_56 : f32 to vector<32x16xf32>
    %88 = arith.maximumf %86, %87 : vector<32x16xf32>
    %89 = arith.addf %51, %88 : vector<32x16xf32>
    %90 = arith.truncf %89 : vector<32x16xf32> to vector<32x16xbf16>
    %c0_57 = arith.constant 0 : index
    %c0_58 = arith.constant 0 : index
    %91 = vector.load %arg5[%c0_57, %c0_58] : memref<2x16xbf16, #tpu.memory_space<vmem>>, vector<2x16xbf16>
    %cst_59 = arith.constant dense<0.000000e+00> : vector<32x2xf32>
    %92 = tpu.matmul %90, %91, %cst_59 {dimension_numbers = #tpu.dot_dimension_numbers<[1], [1], [0], [0], [0, 0, 1, 0], [], []>} : vector<32x16xbf16>, vector<2x16xbf16>, vector<32x2xf32> -> vector<32x2xf32>
    %93 = arith.truncf %75 : vector<32x48xf32> to vector<32x48xbf16>
    %c0_60 = arith.constant 0 : index
    %c0_61 = arith.constant 0 : index
    %94 = vector.load %arg6[%c0_60, %c0_61] : memref<2x48xbf16, #tpu.memory_space<vmem>>, vector<2x48xbf16>
    %cst_62 = arith.constant dense<0.000000e+00> : vector<32x2xf32>
    %95 = tpu.matmul %93, %94, %cst_62 {dimension_numbers = #tpu.dot_dimension_numbers<[1], [1], [0], [0], [0, 0, 1, 0], [], []>} : vector<32x48xbf16>, vector<2x48xbf16>, vector<32x2xf32> -> vector<32x2xf32>
    %c0_63 = arith.constant 0 : index
    %c0_64 = arith.constant 0 : index
    %96 = vector.load %arg22[%c0_63, %c0_64] : memref<64x32xbf16, #tpu.memory_space<vmem>>, vector<64x32xbf16>
    %97 = arith.truncf %92 : vector<32x2xf32> to vector<32x2xbf16>
    %cst_65 = arith.constant dense<0.000000e+00> : vector<64x2xf32>
    %98 = tpu.matmul %96, %97, %cst_65 {dimension_numbers = #tpu.dot_dimension_numbers<[1], [0], [0], [1], [0, 0, 1, 1], [], []>} : vector<64x32xbf16>, vector<32x2xbf16>, vector<64x2xf32> -> vector<64x2xf32>
    %c0_66 = arith.constant 0 : index
    %c0_67 = arith.constant 0 : index
    %99 = vector.load %arg23[%c0_66, %c0_67] : memref<64x32xbf16, #tpu.memory_space<vmem>>, vector<64x32xbf16>
    %100 = arith.truncf %95 : vector<32x2xf32> to vector<32x2xbf16>
    %cst_68 = arith.constant dense<0.000000e+00> : vector<64x2xf32>
    %101 = tpu.matmul %99, %100, %cst_68 {dimension_numbers = #tpu.dot_dimension_numbers<[1], [0], [0], [1], [0, 0, 1, 1], [], []>} : vector<64x32xbf16>, vector<32x2xbf16>, vector<64x2xf32> -> vector<64x2xf32>
    %102 = arith.addf %98, %101 : vector<64x2xf32>
    %c0_69 = arith.constant 0 : index
    %c0_70 = arith.constant 0 : index
    %103 = vector.load %arg24[%c0_69, %c0_70] : memref<64x1xf32, #tpu.memory_space<vmem>>, vector<64x1xf32>
    %104 = vector.broadcast %103 : vector<64x1xf32> to vector<64x2xf32>
    %105 = arith.addf %102, %104 : vector<64x2xf32>
    %cst_71 = arith.constant 0.000000e+00 : f32
    %106 = vector.broadcast %cst_71 : f32 to vector<64x2xf32>
    %107 = arith.maximumf %105, %106 : vector<64x2xf32>
    %c0_72 = arith.constant 0 : index
    %c0_73 = arith.constant 0 : index
    %108 = vector.load %arg25[%c0_72, %c0_73] : memref<1x64xbf16, #tpu.memory_space<vmem>>, vector<1x64xbf16>
    %109 = arith.truncf %107 : vector<64x2xf32> to vector<64x2xbf16>
    %cst_74 = arith.constant dense<0.000000e+00> : vector<1x2xf32>
    %110 = tpu.matmul %108, %109, %cst_74 {dimension_numbers = #tpu.dot_dimension_numbers<[1], [0], [0], [1], [0, 0, 1, 1], [], []>} : vector<1x64xbf16>, vector<64x2xbf16>, vector<1x2xf32> -> vector<1x2xf32>
    %c0_75 = arith.constant 0 : index
    %c0_76 = arith.constant 0 : index
    %111 = vector.load %arg26[%c0_75, %c0_76] : memref<1x1xf32, #tpu.memory_space<vmem>>, vector<1x1xf32>
    %112 = vector.broadcast %111 : vector<1x1xf32> to vector<1x2xf32>
    %113 = arith.addf %110, %112 : vector<1x2xf32>
    %c0_77 = arith.constant 0 : index
    %c0_78 = arith.constant 0 : index
    %114 = vector.load %arg27[%c0_77, %c0_78] : memref<1x2xf32, #tpu.memory_space<vmem>>, vector<1x2xf32>
    tpu.vector_store %arg27[%c0_77, %c0_78], %113 {strides = array<i32>} : memref<1x2xf32, #tpu.memory_space<vmem>>, vector<1x2xf32>,
    return
  }
  func.func @transform_0(%arg0: i32) -> (i32, i32) {
    %c0_i32 = arith.constant 0 : i32
    %c0_i32_0 = arith.constant 0 : i32
    %c0_i32_1 = arith.constant 0 : i32
    return %c0_i32, %c0_i32_0 : i32, i32
  }
  func.func @transform_1(%arg0: i32) -> (i32, i32) {
    %c0_i32 = arith.constant 0 : i32
    %c0_i32_0 = arith.constant 0 : i32
    %c0_i32_1 = arith.constant 0 : i32
    return %c0_i32, %c0_i32_0 : i32, i32
  }
  func.func @transform_2(%arg0: i32) -> (i32, i32) {
    %c0_i32 = arith.constant 0 : i32
    %c0_i32_0 = arith.constant 0 : i32
    %c0_i32_1 = arith.constant 0 : i32
    return %c0_i32, %c0_i32_0 : i32, i32
  }
  func.func @transform_3(%arg0: i32) -> (i32, i32) {
    %c0_i32 = arith.constant 0 : i32
    %c0_i32_0 = arith.constant 0 : i32
    %c0_i32_1 = arith.constant 0 : i32
    return %c0_i32, %c0_i32_0 : i32, i32
  }
  func.func @transform_4(%arg0: i32) -> (i32, i32) {
    %c0_i32 = arith.constant 0 : i32
    %c0_i32_0 = arith.constant 0 : i32
    %c0_i32_1 = arith.constant 0 : i32
    return %c0_i32, %c0_i32_0 : i32, i32
  }
  func.func @transform_5(%arg0: i32) -> (i32, i32) {
    %c0_i32 = arith.constant 0 : i32
    %c0_i32_0 = arith.constant 0 : i32
    %c0_i32_1 = arith.constant 0 : i32
    return %c0_i32, %c0_i32_0 : i32, i32
  }
  func.func @transform_6(%arg0: i32) -> (i32, i32) {
    %c0_i32 = arith.constant 0 : i32
    %c0_i32_0 = arith.constant 0 : i32
    %c0_i32_1 = arith.constant 0 : i32
    return %c0_i32, %c0_i32_0 : i32, i32
  }
  func.func @transform_7(%arg0: i32) -> (i32, i32) {
    %c0_i32 = arith.constant 0 : i32
    %c0_i32_0 = arith.constant 0 : i32
    %c0_i32_1 = arith.constant 0 : i32
    return %c0_i32, %c0_i32_0 : i32, i32
  }
  func.func @transform_8(%arg0: i32) -> (i32, i32) {
    %c0_i32 = arith.constant 0 : i32
    %c0_i32_0 = arith.constant 0 : i32
    %c0_i32_1 = arith.constant 0 : i32
    return %c0_i32, %c0_i32_0 : i32, i32
  }
  func.func @transform_9(%arg0: i32) -> (i32, i32) {
    %c0_i32 = arith.constant 0 : i32
    %c0_i32_0 = arith.constant 0 : i32
    %c0_i32_1 = arith.constant 0 : i32
    return %c0_i32, %c0_i32_0 : i32, i32
  }
  func.func @transform_10(%arg0: i32) -> (i32, i32) {
    %c0_i32 = arith.constant 0 : i32
    %c0_i32_0 = arith.constant 0 : i32
    %c0_i32_1 = arith.constant 0 : i32
    return %c0_i32, %c0_i32_0 : i32, i32
  }
  func.func @transform_11(%arg0: i32) -> (i32, i32) {
    %c0_i32 = arith.constant 0 : i32
    %c0_i32_0 = arith.constant 0 : i32
    %c0_i32_1 = arith.constant 0 : i32
    return %c0_i32, %c0_i32_0 : i32, i32
  }
  func.func @transform_12(%arg0: i32) -> (i32, i32) {
    %c0_i32 = arith.constant 0 : i32
    %c0_i32_0 = arith.constant 0 : i32
    %c0_i32_1 = arith.constant 0 : i32
    return %c0_i32, %c0_i32_0 : i32, i32
  }
  func.func @transform_13(%arg0: i32) -> (i32, i32) {
    %c0_i32 = arith.constant 0 : i32
    %c0_i32_0 = arith.constant 0 : i32
    %c0_i32_1 = arith.constant 0 : i32
    return %c0_i32, %c0_i32_0 : i32, i32
  }
  func.func @transform_14(%arg0: i32) -> (i32, i32) {
    %c0_i32 = arith.constant 0 : i32
    %c0_i32_0 = arith.constant 0 : i32
    %c0_i32_1 = arith.constant 0 : i32
    return %c0_i32, %c0_i32_0 : i32, i32
  }
  func.func @transform_15(%arg0: i32) -> (i32, i32) {
    %c0_i32 = arith.constant 0 : i32
    %c0_i32_0 = arith.constant 0 : i32
    %c0_i32_1 = arith.constant 0 : i32
    return %c0_i32, %c0_i32_0 : i32, i32
  }
  func.func @transform_16(%arg0: i32) -> (i32, i32) {
    %c0_i32 = arith.constant 0 : i32
    %c0_i32_0 = arith.constant 0 : i32
    %c0_i32_1 = arith.constant 0 : i32
    return %c0_i32, %c0_i32_0 : i32, i32
  }
  func.func @transform_17(%arg0: i32) -> (i32, i32) {
    %c0_i32 = arith.constant 0 : i32
    %c0_i32_0 = arith.constant 0 : i32
    %c0_i32_1 = arith.constant 0 : i32
    return %c0_i32, %c0_i32_0 : i32, i32
  }
  func.func @transform_18(%arg0: i32) -> (i32, i32) {
    %c0_i32 = arith.constant 0 : i32
    %c0_i32_0 = arith.constant 0 : i32
    %c0_i32_1 = arith.constant 0 : i32
    return %c0_i32, %c0_i32_0 : i32, i32
  }
  func.func @transform_19(%arg0: i32) -> (i32, i32) {
    %c0_i32 = arith.constant 0 : i32
    %c0_i32_0 = arith.constant 0 : i32
    %c0_i32_1 = arith.constant 0 : i32
    return %c0_i32, %c0_i32_0 : i32, i32
  }
  func.func @transform_20(%arg0: i32) -> (i32, i32) {
    %c0_i32 = arith.constant 0 : i32
    %c0_i32_0 = arith.constant 0 : i32
    %c0_i32_1 = arith.constant 0 : i32
    return %c0_i32, %c0_i32_0 : i32, i32
  }
  func.func @transform_21(%arg0: i32) -> (i32, i32) {
    %c0_i32 = arith.constant 0 : i32
    %c0_i32_0 = arith.constant 0 : i32
    %c0_i32_1 = arith.constant 0 : i32
    return %c0_i32, %c0_i32_0 : i32, i32
  }
  func.func @transform_22(%arg0: i32) -> (i32, i32) {
    %c0_i32 = arith.constant 0 : i32
    %c0_i32_0 = arith.constant 0 : i32
    %c0_i32_1 = arith.constant 0 : i32
    return %c0_i32, %c0_i32_0 : i32, i32
  }
  func.func @transform_23(%arg0: i32) -> (i32, i32) {
    %c0_i32 = arith.constant 0 : i32
    %c0_i32_0 = arith.constant 0 : i32
    %c0_i32_1 = arith.constant 0 : i32
    return %c0_i32, %c0_i32_0 : i32, i32
  }
  func.func @transform_24(%arg0: i32) -> (i32, i32) {
    %c0_i32 = arith.constant 0 : i32
    %c0_i32_0 = arith.constant 0 : i32
    %c0_i32_1 = arith.constant 0 : i32
    return %c0_i32, %c0_i32_0 : i32, i32
  }
  func.func @transform_25(%arg0: i32) -> (i32, i32) {
    %c0_i32 = arith.constant 0 : i32
    %c0_i32_0 = arith.constant 0 : i32
    %c0_i32_1 = arith.constant 0 : i32
    return %c0_i32, %c0_i32_0 : i32, i32
  }
  func.func @transform_26(%arg0: i32) -> (i32, i32) {
    %c0_i32 = arith.constant 0 : i32
    %c0_i32_0 = arith.constant 0 : i32
    %c0_i32_1 = arith.constant 0 : i32
    return %c0_i32, %c0_i32_0 : i32, i32
  }
}

</mosaic_0001>

<bundles_post_ra>
// kernel: tpu_custom_call.1
= control target key start
LH: loop header
LB: loop body
LE: loop exit
PB: predicated region body
PF: predicated region fallthrough
CT: control target
= control target key end

     0   :  { %s3266_s0 = inlined_call_operand.vmem [shape: bf16[8,16], index: 0, kind: input, shape index: {}]   ;;  %s3267_s1 = inlined_call_operand.vmem [shape: bf16[48,16], index: 1, kind: input, shape index: {}]   ;;  %s3268_s2 = inlined_call_operand.vmem [shape: bf16[48,16], index: 2, kind: input, shape index: {}]   ;;  %s3269_s3 = inlined_call_operand.vmem [shape: f32[1,48], index: 3, kind: input, shape index: {}]   ;;  %s3270_s4 = inlined_call_operand.vmem [shape: bf16[2,16], index: 4, kind: input, shape index: {}]   ;;  %s3271_s5 = inlined_call_operand.vmem [shape: bf16[2,48], index: 5, kind: input, shape index: {}]   ;;  %s3272_s6 = inlined_call_operand.vmem [shape: bf16[96,8], index: 6, kind: input, shape index: {}]   ;;  %s3273_s7 = inlined_call_operand.vmem [shape: bf16[64,32], index: 7, kind: input, shape index: {}]   ;;  %s3274_s8 = inlined_call_operand.vmem [shape: bf16[32,32], index: 8, kind: input, shape index: {}]   ;;  %s3275_s9 = inlined_call_operand.vmem [shape: f32[32,1], index: 9, kind: input, shape index: {}]   ;;  %s3276_s10 = inlined_call_operand.vmem [shape: f32[32,1], index: 10, kind: input, shape index: {}]   ;;  %s3277_s11 = inlined_call_operand.vmem [shape: bf16[32,32], index: 11, kind: input, shape index: {}]   ;;  %s3278_s12 = inlined_call_operand.vmem [shape: bf16[32,32], index: 12, kind: input, shape index: {}]   ;;  %s3279_s13 = inlined_call_operand.vmem [shape: f32[32,1], index: 13, kind: input, shape index: {}]   ;;  %s3280_s14 = inlined_call_operand.vmem [shape: bf16[64,32], index: 14, kind: input, shape index: {}]   ;;  %s3281_s15 = inlined_call_operand.vmem [shape: bf16[32,32], index: 15, kind: input, shape index: {}]   ;;  %s3282_s16 = inlined_call_operand.vmem [shape: f32[32,1], index: 16, kind: input, shape index: {}]   ;;  %s3283_s17 = inlined_call_operand.vmem [shape: f32[32,1], index: 17, kind: input, shape index: {}]   ;;  %s3284_s18 = inlined_call_operand.vmem [shape: bf16[32,32], index: 18, kind: input, shape index: {}]   ;;  %s3285_s19 = inlined_call_operand.vmem [shape: bf16[32,32], index: 19, kind: input, shape index: {}]   ;;  %s3286_s20 = inlined_call_operand.vmem [shape: f32[32,1], index: 20, kind: input, shape index: {}]   ;;  %s3287_s21 = inlined_call_operand.vmem [shape: bf16[64,32], index: 21, kind: input, shape index: {}]   ;;  %s3288_s22 = inlined_call_operand.vmem [shape: bf16[64,32], index: 22, kind: input, shape index: {}]   ;;  %s3289_s23 = inlined_call_operand.vmem [shape: f32[64,1], index: 23, kind: input, shape index: {}]   ;;  %s3290_s24 = inlined_call_operand.vmem [shape: bf16[1,64], index: 24, kind: input, shape index: {}]   ;;  %s3291_s25 = inlined_call_operand.<no memory space> [shape: f32[1,1], index: 25, kind: input, shape index: {}]   ;;  %s3292_s26 = inlined_call_operand.hbm [shape: f32[1,2], index: 26, kind: output, shape index: {}]  }
   0x1   :  { %3300 = sst [smem:[#allocation6_spill]] %s3266_s0  ;;  %v31_v0 = vstv %s3291_s25 }
   0x2   :  { %3301 = sst [smem:[#allocation7_spill]] %s3267_s1  ;;  %32 = vst [vmem:[#allocation2] sm:$0x1] %v31_v0 }
   0x3   :  { %3302 = sst [smem:[#allocation8_spill]] %s3268_s2 }
   0x4   :  { %3303 = sst [smem:[#allocation9_spill]] %s3269_s3 }
   0x5   :  { %3304 = sst [smem:[#allocation10_spill]] %s3270_s4 }
   0x6   :  { %3305 = sst [smem:[#allocation11_spill]] %s3271_s5 }
   0x7   :  { %3306 = sst [smem:[#allocation12_spill]] %s3272_s6 }
   0x8   :  { %3307 = sst [smem:[#allocation13_spill]] %s3273_s7 }
   0x9   :  { %3308 = sst [smem:[#allocation14_spill]] %s3274_s8 }
   0xa   :  { %3309 = sst [smem:[#allocation15_spill]] %s3275_s9 }
   0xb   :  { %3310 = sst [smem:[#allocation16_spill]] %s3276_s10 }
   0xc   :  { %s3311_s8 = sld [smem:[#allocation6_spill]]  ;;  %vm162_vm0 = vcmask 1043456   ;;  %s3312_s0 = sld [smem:[#allocation12_spill]]  ;;  %vm143_vm1 = vcmask 64512   ;;  %vm266_vm2 = vcmask 130048  }
   0xd   :  { %s3313_s27 = sld [smem:[#allocation8_spill]] }
  0x12   :  { %v112_v1 = vld [vmem:[%s3311_s8] sm:$0xf]  ;;  %v2570_v4 = vld [vmem:[%s3312_s0 + $0x8] sm:$0xff]   ;;  %v2571_v5 = vld [vmem:[%s3312_s0 + $0x10] sm:$0xff]  }
  0x13   :  { %v2569_v2 = vld [vmem:[%s3312_s0] sm:$0xff]   ;;  %2542 = vmatprep.subr.msk.bf16.mxu0 %vm162_vm0, %v112_v1  ;;  %v164_v3 = vsel %vm162_vm0, %v112_v1, 0  ;;  %v2572_v6 = vld [vmem:[%s3312_s0 + $0x18] sm:$0xff]   ;;  %v2574_v10 = vld [vmem:[%s3312_s0 + $0x28] sm:$0xff]  }
  0x14   :  { %2293 = vmatpush3.bf16.msra.mxu0 %v164_v3  ;;  %2294 = vmatprep.mubr.msk.bf16.mxu0 %vm143_vm1, %v2569_v2  ;;  %v2796_v7 = vld [vmem:[%s3313_s27] sm:$0xff]  }
  0x15   :  { %v2573_v8 = vld [vmem:[%s3312_s0 + $0x20] sm:$0xff]   ;;  %2543 = vmatprep.subr.msk.bf16.mxu1 %vm266_vm2, %v2796_v7  ;;  %v2805_v9 = vsel %vm266_vm2, %v2796_v7, 0 }
  0x16   :  { %2307 = vmatpush3.bf16.xpose.msra.mxu1 %v2805_v9 }
  0x17   :  { %2295 = vmatmul.mubr.msk.bf16.vlgmr.msra.gmra.mrb[0].mxu0 %vm143_vm1, %v2570_v4 }
  0x18   :  { %2298 = vmatprep.mubr.msk.bf16.mxu0 %vm143_vm1, %v2571_v5 }
  0x1f   :  { %2299 = vmatmul.mubr.msk.bf16.gmra.mrb[4].mxu0 %vm143_vm1, %v2572_v6 }
  0x20   :  { %2302 = vmatprep.mubr.msk.bf16.mxu0 %vm143_vm1, %v2573_v8 }
  0x27   :  { %2303 = vmatmul.mubr.msk.bf16.gmra.mrb[8].mxu0 %vm143_vm1, %v2574_v10 }
  0x28   :  { %33 = vsyncpa [#allocation4], 0  ;;  %v2817_v11 = vld [vmem:[%s3313_s27 + $0x8] sm:$0xff]   ;;  %s3314_s0 = sld [smem:[#allocation13_spill]]  ;;  %vm440_vm3 = vcmask 261120   ;;  %v2832_v14 = vld [vmem:[%s3313_s27 + $0x10] sm:$0xff]  }
  0x29   :  { %2544 = vmatprep.subr.msk.bf16.mxu1 %vm266_vm2, %v2817_v11  ;;  %v2823_v12 = vsel %vm266_vm2, %v2817_v11, 0  ;;  %v2839_v15 = vsel %vm266_vm2, %v2832_v14, 0  ;;  %s3315_s6 = sld [smem:[#allocation7_spill]]  ;;  %v2633_v45 = vmov 0   ;;  %s3317_s8 = sld [smem:[#allocation16_spill]]  ;;  %v982_v52 = vld [vmem:[%s3279_s13] sm:$0xff] }
  0x2a   :  { %2309 = vmatpush3.bf16.xpose.msra.mxu1 %v2823_v12  ;;  %s3316_s2 = sld [smem:[#allocation15_spill]]  ;;  %2567 = vset.pattern.permute.xlu0 %v2633_v45  ;;  %v983_v53 = vld [vmem:[%s3279_s13 + $0x8] sm:$0xff]  ;;  %v984_v54 = vld [vmem:[%s3279_s13 + $0x10] sm:$0xff]  ;;  %v985_v55 = vld [vmem:[%s3279_s13 + $0x18] sm:$0xff]  ;;  %s3318_s29 = sld [smem:[#allocation14_spill]]  ;;  %vm786_vm4 = vcmask 392192  }
  0x2b   :  { %2545 = vmatprep.subr.msk.bf16.mxu1 %vm266_vm2, %v2832_v14  ;;  %2568 = vset.pattern.permute.xlu1 %v2633_v45  ;;  %v1314_v56 = vld [vmem:[%s3282_s16] sm:$0xff]  ;;  %v1315_v57 = vld [vmem:[%s3282_s16 + $0x8] sm:$0xff]  ;;  %v1316_v58 = vld [vmem:[%s3282_s16 + $0x10] sm:$0xff]  ;;  %s3319_s25 = sld [smem:[#allocation9_spill]]  ;;  %s3321_s27 = sld [smem:[#allocation11_spill]]  ;;  %vm2635_vm5 = vmmov 0  }
  0x2c   :  { %v1317_v59 = vld [vmem:[%s3282_s16 + $0x18] sm:$0xff]  ;;  %v1346_v60 = vld [vmem:[%s3283_s17] sm:$0xff]  ;;  %v1347_v61 = vld [vmem:[%s3283_s17 + $0x8] sm:$0xff]  ;;  %vm2030_vm6 = vcmask 523264   ;;  %vm2074_vm7 = vcmask 8192  }
  0x2d   :  { %v1348_v62 = vld [vmem:[%s3283_s17 + $0x10] sm:$0xff]  ;;  %v1349_v63 = vld [vmem:[%s3283_s17 + $0x18] sm:$0xff]  ;;  %v1579_v0 = vld [vmem:[%s3286_s20] sm:$0xff] }
  0x2e   :  { %v2577_v13 = vld [vmem:[%s3314_s0] sm:$0xff]   ;;  %v2579_v26 = vld [vmem:[%s3314_s0 + $0x8] sm:$0xff]   ;;  %v2580_v29 = vld [vmem:[%s3314_s0 + $0x10] sm:$0xff]  }
  0x2f   :  { %2330 = vmatprep.mubr.msk.bf16.mxu0 %vm440_vm3, %v2577_v13  ;;  %v2845_v16 = vld [vmem:[%s3315_s6] sm:$0xff]   ;;  %v2582_v34 = vld [vmem:[%s3314_s0 + $0x18] sm:$0xff]   ;;  %v2890_v39 = vld [vmem:[%s3315_s6 + $0x8] sm:$0xff]   ;;  %s2636_s0 = smov [#allocation3]  }
  0x30   :  { %v2885_v38 = vsel %vm266_vm2, %v2845_v16, 0  ;;  %v2904_v40 = vsel %vm266_vm2, %v2890_v39, 0  ;;  %v2909_v41 = vld [vmem:[%s3315_s6 + $0x10] sm:$0xff]   ;;  %v707_v43 = vld [vmem:[%s3316_s2] sm:$0xff]  ;;  %v708_v46 = vld [vmem:[%s3316_s2 + $0x8] sm:$0xff]  ;;  %s3320_s6 = sld [smem:[#allocation10_spill]] }
  0x31   :  { %v2919_v42 = vsel %vm266_vm2, %v2909_v41, 0  ;;  %v709_v44 = vld [vmem:[%s3316_s2 + $0x10] sm:$0xff]  ;;  %713 = vperm.xlu0 %2567, %v707_v43   ;;  %v710_v47 = vld [vmem:[%s3316_s2 + $0x18] sm:$0xff]  ;;  %v745_v48 = vld [vmem:[%s3317_s8] sm:$0xff] }
  0x32   :  { %2311 = vmatpush3.bf16.xpose.msra.mxu1 %v2839_v15  ;;  %723 = vperm.xlu1 %2568, %v709_v44   ;;  %v746_v49 = vld [vmem:[%s3317_s8 + $0x8] sm:$0xff]  ;;  %v747_v50 = vld [vmem:[%s3317_s8 + $0x10] sm:$0xff]  ;;  %v748_v51 = vld [vmem:[%s3317_s8 + $0x18] sm:$0xff] }
  0x33   :  { %2546 = vmatprep.subr.msk.bf16.mxu1 %vm266_vm2, %v2845_v16  ;;  %v1580_v1 = vld [vmem:[%s3286_s20 + $0x8] sm:$0xff]  ;;  %v1581_v2 = vld [vmem:[%s3286_s20 + $0x10] sm:$0xff]  ;;  %v1582_v3 = vld [vmem:[%s3286_s20 + $0x18] sm:$0xff] }
  0x34   :  { %v1951_v4 = vld [vmem:[%s3289_s23] sm:$0xff]  ;;  %v1952_v5 = vld [vmem:[%s3289_s23 + $0x8] sm:$0xff]  ;;  %v1953_v6 = vld [vmem:[%s3289_s23 + $0x10] sm:$0xff] }
  0x35   :  { %718 = vperm.xlu0 %2567, %v708_v46   ;;  %v1954_v8 = vld [vmem:[%s3289_s23 + $0x18] sm:$0xff]  ;;  %v1955_v10 = vld [vmem:[%s3289_s23 + $0x20] sm:$0xff]  ;;  %v1956_v13 = vld [vmem:[%s3289_s23 + $0x28] sm:$0xff] }
  0x36   :  { %728 = vperm.xlu1 %2568, %v710_v47  }
  0x39   :  { %751 = vperm.xlu0 %2567, %v745_v48   ;;  %v2585_v48 = vld [vmem:[%s3318_s29] sm:$0xff]  }
  0x3a   :  { %756 = vperm.xlu1 %2568, %v746_v49  }
  0x3d   :  { %761 = vperm.xlu0 %2567, %v747_v50   ;;  %v2586_v50 = vld [vmem:[%s3318_s29 + $0x8] sm:$0xff]  }
  0x3e   :  { %766 = vperm.xlu1 %2568, %v748_v51  }
  0x41   :  { %988 = vperm.xlu0 %2567, %v982_v52  }
  0x42   :  { %993 = vperm.xlu1 %2568, %v983_v53  }
  0x45   :  { %998 = vperm.xlu0 %2567, %v984_v54  }
  0x46   :  { %1003 = vperm.xlu1 %2568, %v985_v55  }
  0x49   :  { %1320 = vperm.xlu0 %2567, %v1314_v56  }
  0x4a   :  { %1325 = vperm.xlu1 %2568, %v1315_v57  }
  0x4d   :  { %1330 = vperm.xlu0 %2567, %v1316_v58  }
  0x4e   :  { %1335 = vperm.xlu1 %2568, %v1317_v59  }
  0x51   :  { %1352 = vperm.xlu0 %2567, %v1346_v60  }
  0x52   :  { %1357 = vperm.xlu1 %2568, %v1347_v61  }
  0x55   :  { %1362 = vperm.xlu0 %2567, %v1348_v62  }
  0x56   :  { %1367 = vperm.xlu1 %2568, %v1349_v63  }
  0x59   :  { %1585 = vperm.xlu0 %2567, %v1579_v0  }
  0x5a   :  { %1590 = vperm.xlu1 %2568, %v1580_v1  }
  0x5d   :  { %1595 = vperm.xlu0 %2567, %v1581_v2  }
  0x5e   :  { %1600 = vperm.xlu1 %2568, %v1582_v3  }
  0x61   :  { %1961 = vperm.xlu0 %2567, %v1951_v4  }
  0x62   :  { %1966 = vperm.xlu1 %2568, %v1952_v5  }
  0x65   :  { %1971 = vperm.xlu0 %2567, %v1953_v6  }
  0x66   :  { %1976 = vperm.xlu1 %2568, %v1954_v8  }
  0x69   :  { %1981 = vperm.xlu0 %2567, %v1955_v10  }
  0x6a   :  { %1986 = vperm.xlu1 %2568, %v1956_v13  }
  0xb0   :  { %v714_v51 = vpop.permute.xlu0 %713 }
  0xb1   :  { %v724_v52 = vpop.permute.xlu1 %723 }
  0xb4   :  { %v719_v53 = vpop.permute.xlu0 %718 }
  0xb5   :  { %v729_v54 = vpop.permute.xlu1 %728 }
  0xb8   :  { %v752_v55 = vpop.permute.xlu0 %751 }
  0xb9   :  { %v757_v56 = vpop.permute.xlu1 %756 }
  0xbc   :  { %v762_v61 = vpop.permute.xlu0 %761 }
  0xbd   :  { %v767_v3 = vpop.permute.xlu1 %766 }
  0xea   :  { %v2849_v17 = vpop.f32.mrb[0].mxu0 }
  0xeb   :  { %v2851_v18 = vpop.f32.mrb[1].mxu0 }
  0xec   :  { %v2853_v19 = vpop.f32.mrb[2].mxu0 }
  0xed   :  { %v2857_v20 = vpack.c.bf16 %v2853_v19, %v2849_v17  ;;  %v2859_v21 = vpop.f32.mrb[3].mxu0 }
  0xee   :  { %v2863_v22 = vpack.c.bf16 %v2859_v21, %v2851_v18 }
  0xf0   :  { %2326 = vmatprep.subr.bf16.mxu0 %v2863_v22 }
  0xf1   :  { %2327 = vmatpush3.bf16.msra.mxu0 %v2863_v22 }
  0xf2   :  { %2328 = vmatprep.subr.bf16.mxu0 %v2857_v20  ;;  %v2300_v23 = vpop.f32.mrb[4].mxu0 }
  0xf3   :  { %v216_v24 = vpop.f32.mrb[5].mxu0 }
  0xf4   :  { %v2301_v25 = vpop.f32.mrb[6].mxu0 }
  0xf5   :  { %2329 = vmatpush3.bf16.msra.mxu0 %v2857_v20  ;;  %v248_v27 = vpack.c.bf16 %v2301_v25, %v2300_v23  ;;  %v219_v28 = vpop.f32.mrb[7].mxu0  ;;  %v1957_v23 = vld [vmem:[%s3289_s23 + $0x30] sm:$0xff]  ;;  %v2020_v25 = vld [vmem:[#allocation2] sm:$0x1] }
  0xf6   :  { %v247_v30 = vpack.c.bf16 %v219_v28, %v216_v24  ;;  %2549 = vmatprep.subr.msk.bf16.mxu0 %vm266_vm2, %v2796_v7  ;;  %v1958_v24 = vld [vmem:[%s3289_s23 + $0x38] sm:$0xff]  ;;  %1991 = vperm.xlu0 %2567, %v1957_v23  }
  0xf7   :  { %1996 = vperm.xlu1 %2568, %v1958_v24  }
  0xf8   :  { %2331 = vmatmul.mubr.msk.bf16.vlgmr.msra.gmra.mrb[12].mxu0 %vm440_vm3, %v2579_v26 }
  0xf9   :  { %2334 = vmatprep.mubr.msk.bf16.mxu0 %vm440_vm3, %v2580_v29 }
  0xfa   :  { %v2304_v31 = vpop.f32.mrb[8].mxu0  ;;  %2023 = vperm.xlu0 %2567, %v2020_v25  }
  0xfb   :  { %v232_v32 = vpop.f32.mrb[9].mxu0 }
  0xfc   :  { %v2305_v33 = vpop.f32.mrb[10].mxu0 }
  0xfd   :  { %v250_v35 = vpack.c.bf16 %v2305_v33, %v2304_v31  ;;  %v235_v36 = vpop.f32.mrb[11].mxu0 }
  0xfe   :  { %v249_v37 = vpack.c.bf16 %v235_v36, %v232_v32  ;;  %2339 = vmatpush3.bf16.xpose.msra.mxu0 %v2805_v9 }
  0xff   :  { %2550 = vmatprep.subr.msk.bf16.mxu0 %vm266_vm2, %v2817_v11 }
 0x100   :  { %2312 = vmatprep.mubr.msk.bf16.mxu1 %vm266_vm2, %v249_v37  ;;  %2335 = vmatmul.mubr.msk.bf16.gmra.mrb[16].mxu0 %vm440_vm3, %v2582_v34 }
 0x101   :  { %2313 = vmatmul.mubr.msk.bf16.vlgmr.msra.gmra.mrb[0].mxu1 %vm266_vm2, %v250_v35 }
 0x102   :  { %2317 = vmatpush3.bf16.xpose.msra.mxu1 %v2885_v38  ;;  %2322 = vmatprep.mubr.msk.bf16.mxu1 %vm266_vm2, %v247_v30 }
 0x103   :  { %2547 = vmatprep.subr.msk.bf16.mxu1 %vm266_vm2, %v2890_v39 }
 0x106   :  { %2341 = vmatpush3.bf16.xpose.msra.mxu0 %v2823_v12 }
 0x107   :  { %2551 = vmatprep.subr.msk.bf16.mxu0 %vm266_vm2, %v2832_v14 }
 0x10a   :  { %2319 = vmatpush3.bf16.xpose.msra.mxu1 %v2904_v40 }
 0x10b   :  { %2548 = vmatprep.subr.msk.bf16.mxu1 %vm266_vm2, %v2909_v41 }
 0x10e   :  { %2343 = vmatpush3.bf16.xpose.msra.mxu0 %v2839_v15 }
 0x10f   :  { %2552 = vmatprep.subr.msk.bf16.mxu0 %vm266_vm2, %v2845_v16 }
 0x112   :  { %2321 = vmatpush3.bf16.xpose.msra.mxu1 %v2919_v42 }
 0x113   :  { %2366 = vmatprep.subr.bf16.mxu1 %v2796_v7 }
 0x119   :  { %2323 = vmatmul.mubr.msk.bf16.vlgmr.msra.gmra.mrb[0].mxu1 %vm266_vm2, %v248_v27 }
 0x11a   :  { %2367 = vmatpush3.bf16.msra.mxu1 %v2796_v7 }
 0x11b   :  { %2368 = vmatprep.subr.bf16.mxu1 %v2817_v11 }
 0x11e   :  { %2369 = vmatpush3.bf16.msra.mxu1 %v2817_v11 }
 0x11f   :  { %2370 = vmatprep.subr.bf16.mxu1 %v2832_v14 }
 0x122   :  { %2371 = vmatpush3.bf16.msra.mxu1 %v2832_v14 }
 0x1cb   :  { %v2332_v26 = vpop.f32.mrb[12].mxu0 }
 0x1cc   :  { %v487_v27 = vpop.f32.mrb[13].mxu0 }
 0x1cd   :  { %v2333_v28 = vpop.f32.mrb[14].mxu0 }
 0x1ce   :  { %v519_v29 = vpack.c.bf16 %v2333_v28, %v2332_v26  ;;  %v490_v30 = vpop.f32.mrb[15].mxu0 }
 0x1cf   :  { %v518_v31 = vpack.c.bf16 %v490_v30, %v487_v27 }
 0x1d3   :  { %v2336_v32 = vpop.f32.mrb[16].mxu0 }
 0x1d4   :  { %v503_v33 = vpop.f32.mrb[17].mxu0 }
 0x1d5   :  { %v2337_v34 = vpop.f32.mrb[18].mxu0 }
 0x1d6   :  { %v521_v35 = vpack.c.bf16 %v2337_v34, %v2336_v32  ;;  %v506_v36 = vpop.f32.mrb[19].mxu0 }
 0x1d7   :  { %v520_v37 = vpack.c.bf16 %v506_v36, %v503_v33 }
 0x1d9   :  { %2344 = vmatprep.mubr.msk.bf16.mxu0 %vm266_vm2, %v520_v37 }
 0x1da   :  { %2345 = vmatmul.mubr.msk.bf16.vlgmr.msra.gmra.mrb[20].mxu0 %vm266_vm2, %v521_v35 }
 0x1db   :  { %2349 = vmatpush3.bf16.xpose.msra.mxu0 %v2885_v38  ;;  %2354 = vmatprep.mubr.msk.bf16.mxu0 %vm266_vm2, %v518_v31  ;;  %v2587_v31 = vld [vmem:[%s3278_s12] sm:$0xff]  }
 0x1dc   :  { %2553 = vmatprep.subr.msk.bf16.mxu0 %vm266_vm2, %v2890_v39 }
 0x1e3   :  { %2351 = vmatpush3.bf16.xpose.msra.mxu0 %v2904_v40 }
 0x1e4   :  { %2554 = vmatprep.subr.msk.bf16.mxu0 %vm266_vm2, %v2909_v41 }
 0x1eb   :  { %2353 = vmatpush3.bf16.xpose.msra.mxu0 %v2919_v42 }
 0x1ec   :  { %v2324_v43 = vpop.f32.mrb[0].mxu1 }
 0x1ed   :  { %v395_v44 = vpop.f32.mrb[1].mxu1 }
 0x1ee   :  { %v2325_v45 = vpop.f32.mrb[2].mxu1 }
 0x1ef   :  { %v637_v46 = vpack.c.bf16 %v2325_v45, %v2324_v43  ;;  %v398_v47 = vpop.f32.mrb[3].mxu1 }
 0x1f0   :  { %v636_v49 = vpack.c.bf16 %v398_v47, %v395_v44 }
 0x1f2   :  { %2355 = vmatmul.mubr.msk.bf16.vlgmr.msra.gmra.mrb[20].mxu0 %vm266_vm2, %v519_v29  ;;  %2358 = vmatprep.subr.bf16.mxu0 %v636_v49 }
 0x1f3   :  { %2359 = vmatpush3.bf16.msra.mxu0 %v636_v49  ;;  %2362 = vmatprep.mubr.msk.bf16.mxu0 %vm440_vm3, %v2585_v48 }
 0x1f4   :  { %2360 = vmatprep.subr.bf16.mxu0 %v637_v46 }
 0x1f7   :  { %2361 = vmatpush3.bf16.msra.mxu0 %v637_v46  ;;  %v2591_v46 = vld [vmem:[%s3280_s14] sm:$0xff]  }
 0x1f8   :  { %2555 = vmatprep.subr.msk.bf16.mxu0 %vm266_vm2, %v2796_v7 }
 0x1fe   :  { %2363 = vmatmul.mubr.msk.bf16.vlgmr.msra.gmra.mrb[20].mxu0 %vm440_vm3, %v2586_v50 }
 0x200   :  { %2405 = vmatpush3.bf16.xpose.msra.mxu0 %v2805_v9  ;;  %v3060_v9 = vld [vmem:[%s3319_s25] ss:$0 sm:$0xff]  ;;  %s2082_s25 = sshll.u32 %s2636_s0, 4  ;;  %s2083_s25 = int_to_ptr.vmem [resolvable:$true] %s2082_s25 }
 0x201   :  { %2556 = vmatprep.subr.msk.bf16.mxu0 %vm266_vm2, %v2817_v11  ;;  %v737_v57 = vmul.f32 %v3060_v9, %v714_v51  ;;  %v738_v60 = vmul.f32 %v3060_v9, %v719_v53  ;;  %s2609_s13 = scalar_lea.vmem %s2083_s25, 16  ;;  %p2614_p1 = scmp.lt.s32.totalorder %s2083_s25, %s2083_s25 }
 0x202   :  { %p2610_p0 = scmp.ne.s32.totalorder %s2083_s25, %s2609_s13 }
 0x208   :  { %2407 = vmatpush3.bf16.xpose.msra.mxu0 %v2823_v12  ;;  %v739_v12 = vmul.f32 %v3060_v9, %v724_v52 }
 0x209   :  { %2557 = vmatprep.subr.msk.bf16.mxu0 %vm266_vm2, %v2832_v14 }
 0x210   :  { %2409 = vmatpush3.bf16.xpose.msra.mxu0 %v2839_v15  ;;  %v740_v15 = vmul.f32 %v3060_v9, %v729_v54 }
 0x211   :  { %2558 = vmatprep.subr.msk.bf16.mxu0 %vm266_vm2, %v2845_v16 }
 0x2d1   :  { %v2364_v58 = vpop.f32.mrb[20].mxu0 }
 0x2d2   :  { %v743_v59 = vadd.f32 %v2364_v58, %v739_v12  ;;  %v688_v16 = vpop.f32.mrb[21].mxu0 }
 0x2d3   :  { %v741_v62 = vadd.f32 %v737_v57, %v688_v16  ;;  %v2365_v63 = vpop.f32.mrb[22].mxu0 }
 0x2d4   :  { %v771_v0 = vadd.f32 %v762_v61, %v743_v59  ;;  %v744_v1 = vadd.f32 %v2365_v63, %v740_v15  ;;  %v691_v2 = vpop.f32.mrb[23].mxu0 }
 0x2d5   :  { %v769_v4 = vadd.f32 %v752_v55, %v741_v62  ;;  %v742_v5 = vadd.f32 %v738_v60, %v691_v2 }
 0x2d6   :  { %v775_v6 = vmax.f32 %v771_v0, 0.0  ;;  %v772_v8 = vadd.f32 %v767_v3, %v744_v1 }
 0x2d7   :  { %v773_v10 = vmax.f32 %v769_v4, 0.0  ;;  %v770_v13 = vadd.f32 %v757_v56, %v742_v5 }
 0x2d8   :  { %v3066_v23 = vadd.f32 %v2324_v43, %v775_v6  ;;  %v776_v24 = vmax.f32 %v772_v8, 0.0  ;;  %v2588_v43 = vld [vmem:[%s3278_s12 + $0x8] sm:$0xff]  }
 0x2d9   :  { %v3068_v25 = vadd.f32 %v773_v10, %v395_v44  ;;  %v774_v26 = vmax.f32 %v770_v13, 0.0  ;;  %v2589_v44 = vld [vmem:[%s3277_s11] sm:$0xff]  }
 0x2da   :  { %v3070_v27 = vadd.f32 %v2325_v45, %v776_v24  ;;  %v782_v28 = vpack.c.bf16 %v776_v24, %v775_v6  ;;  %v2590_v45 = vld [vmem:[%s3277_s11 + $0x8] sm:$0xff]  }
 0x2db   :  { %v3072_v29 = vadd.f32 %v774_v26, %v398_v47  ;;  %v781_v30 = vpack.c.bf16 %v774_v26, %v773_v10  ;;  %v989_v47 = vpop.permute.xlu0 %988 }
 0x2dd   :  { %2372 = vmatprep.mubr.msk.bf16.mxu1 %vm786_vm4, %v781_v30 }
 0x2de   :  { %2373 = vmatmul.mubr.msk.bf16.vlgmr.msra.gmra.mrb[4].mxu1 %vm786_vm4, %v782_v28 }
 0x2df   :  { %2380 = vmatprep.mubr.msk.bf16.mxu1 %vm440_vm3, %v2587_v31  ;;  %v999_v48 = vpop.permute.xlu0 %998 }
 0x3b1   :  { %v2374_v32 = vpop.f32.mrb[4].mxu1 }
 0x3b2   :  { %v827_v33 = vpop.f32.mrb[5].mxu1 }
 0x3b3   :  { %v2375_v34 = vpop.f32.mrb[6].mxu1 }
 0x3b4   :  { %v851_v35 = vpack.c.bf16 %v2375_v34, %v2374_v32  ;;  %v830_v36 = vpop.f32.mrb[7].mxu1 }
 0x3b5   :  { %v850_v37 = vpack.c.bf16 %v830_v36, %v827_v33 }
 0x3b7   :  { %2376 = vmatprep.subr.bf16.mxu1 %v850_v37 }
 0x3b8   :  { %2377 = vmatpush3.bf16.msra.mxu1 %v850_v37 }
 0x3b9   :  { %2378 = vmatprep.subr.bf16.mxu1 %v851_v35 }
 0x3bc   :  { %2379 = vmatpush3.bf16.msra.mxu1 %v851_v35 }
 0x3bd   :  { %2384 = vmatprep.subr.bf16.mxu1 %v2863_v22 }
 0x3bf   :  { %2381 = vmatmul.mubr.msk.bf16.vlgmr.msra.gmra.mrb[8].mxu1 %vm440_vm3, %v2588_v43 }
 0x3c0   :  { %2385 = vmatpush3.bf16.msra.mxu1 %v2863_v22  ;;  %2388 = vmatprep.mubr.msk.bf16.mxu1 %vm440_vm3, %v2589_v44  ;;  %v994_v22 = vpop.permute.xlu1 %993 }
 0x3c1   :  { %2386 = vmatprep.subr.bf16.mxu1 %v2857_v20 }
 0x3c4   :  { %2387 = vmatpush3.bf16.msra.mxu1 %v2857_v20  ;;  %v1004_v52 = vpop.permute.xlu1 %1003 }
 0x3cb   :  { %2389 = vmatmul.mubr.msk.bf16.vlgmr.msra.gmra.mrb[8].mxu1 %vm440_vm3, %v2590_v45 }
 0x3cc   :  { %2396 = vmatprep.mubr.msk.bf16.mxu1 %vm440_vm3, %v2591_v46 }
 0x49e   :  { %v2390_v49 = vpop.f32.mrb[8].mxu1 }
 0x49f   :  { %v1008_v50 = vadd.f32 %v2390_v49, %v999_v48  ;;  %v967_v51 = vpop.f32.mrb[9].mxu1 }
 0x4a0   :  { %v1006_v20 = vadd.f32 %v989_v47, %v967_v51  ;;  %v2391_v53 = vpop.f32.mrb[10].mxu1 }
 0x4a1   :  { %v1012_v54 = vmax.f32 %v1008_v50, 0.0  ;;  %v1009_v55 = vadd.f32 %v2391_v53, %v1004_v52  ;;  %v970_v56 = vpop.f32.mrb[11].mxu1 }
 0x4a2   :  { %v1010_v12 = vmax.f32 %v1006_v20, 0.0  ;;  %v1007_v57 = vadd.f32 %v994_v22, %v970_v56 }
 0x4a3   :  { %v3101_v58 = vadd.f32 %v2849_v17, %v1012_v54  ;;  %v1013_v15 = vmax.f32 %v1009_v55, 0.0  ;;  %v2592_v17 = vld [vmem:[%s3280_s14 + $0x8] sm:$0xff]  }
 0x4a4   :  { %v3104_v59 = vadd.f32 %v1010_v12, %v2851_v18  ;;  %v1011_v16 = vmax.f32 %v1007_v57, 0.0  ;;  %v2593_v18 = vld [vmem:[%s3280_s14 + $0x10] sm:$0xff]  }
 0x4a5   :  { %v3107_v60 = vadd.f32 %v2853_v19, %v1013_v15  ;;  %v2594_v19 = vld [vmem:[%s3280_s14 + $0x18] sm:$0xff]  }
 0x4a6   :  { %v3110_v61 = vadd.f32 %v1011_v16, %v2859_v21 }
 0x4a7   :  { %v3118_v63 = vpack.c.bf16 %v3107_v60, %v3101_v58 }
 0x4a8   :  { %v3114_v62 = vpack.c.bf16 %v3110_v61, %v3104_v59 }
 0x4aa   :  { %2392 = vmatprep.subr.bf16.mxu1 %v3114_v62 }
 0x4ab   :  { %2393 = vmatpush3.bf16.msra.mxu1 %v3114_v62 }
 0x4ac   :  { %2394 = vmatprep.subr.bf16.mxu1 %v3118_v63 }
 0x4af   :  { %2395 = vmatpush3.bf16.msra.mxu1 %v3118_v63 }
 0x4b0   :  { %2432 = vmatprep.subr.bf16.mxu1 %v2796_v7 }
 0x4b2   :  { %2397 = vmatmul.mubr.msk.bf16.vlgmr.msra.gmra.mrb[12].mxu1 %vm440_vm3, %v2592_v17 }
 0x4b3   :  { %2400 = vmatprep.mubr.msk.bf16.mxu1 %vm440_vm3, %v2593_v18  ;;  %2433 = vmatpush3.bf16.msra.mxu1 %v2796_v7 }
 0x4b4   :  { %2434 = vmatprep.subr.bf16.mxu1 %v2817_v11 }
 0x4b7   :  { %2435 = vmatpush3.bf16.msra.mxu1 %v2817_v11  ;;  %v1243_v11 = vpack.c.bf16 %v3072_v29, %v3068_v25 }
 0x4b8   :  { %2436 = vmatprep.subr.bf16.mxu1 %v2832_v14 }
 0x4ba   :  { %2401 = vmatmul.mubr.msk.bf16.gmra.mrb[16].mxu1 %vm440_vm3, %v2594_v19 }
 0x4bb   :  { %2437 = vmatpush3.bf16.msra.mxu1 %v2832_v14  ;;  %v2595_v14 = vld [vmem:[%s3281_s15] sm:$0xff]  }
 0x585   :  { %v2398_v21 = vpop.f32.mrb[12].mxu1 }
 0x586   :  { %v1094_v0 = vpop.f32.mrb[13].mxu1 }
 0x587   :  { %v2399_v1 = vpop.f32.mrb[14].mxu1 }
 0x588   :  { %v1126_v2 = vpack.c.bf16 %v2399_v1, %v2398_v21  ;;  %v1097_v3 = vpop.f32.mrb[15].mxu1  ;;  %v2599_v1 = vld [vmem:[%s3284_s18] sm:$0xff]  }
 0x589   :  { %v1125_v7 = vpack.c.bf16 %v1097_v3, %v1094_v0  ;;  %v2598_v0 = vld [vmem:[%s3285_s19 + $0x8] sm:$0xff]   ;;  %v1617_v3 = vld [vmem:[%s3320_s6] sm:$0x1] }
 0x58d   :  { %v2402_v4 = vpop.f32.mrb[16].mxu1 }
 0x58e   :  { %v1110_v5 = vpop.f32.mrb[17].mxu1 }
 0x58f   :  { %v2403_v6 = vpop.f32.mrb[18].mxu1 }
 0x590   :  { %v1128_v8 = vpack.c.bf16 %v2403_v6, %v2402_v4  ;;  %v1113_v10 = vpop.f32.mrb[19].mxu1 }
 0x591   :  { %v1127_v13 = vpack.c.bf16 %v1113_v10, %v1110_v5 }
 0x593   :  { %2410 = vmatprep.mubr.msk.bf16.mxu0 %vm266_vm2, %v1127_v13 }
 0x594   :  { %2411 = vmatmul.mubr.msk.bf16.vlgmr.msra.gmra.mrb[24].mxu0 %vm266_vm2, %v1128_v8 }
 0x595   :  { %2415 = vmatpush3.bf16.xpose.msra.mxu0 %v2885_v38  ;;  %2420 = vmatprep.mubr.msk.bf16.mxu0 %vm266_vm2, %v1125_v7  ;;  %v1244_v38 = vpack.c.bf16 %v3070_v27, %v3066_v23  ;;  %v1678_v7 = vld [vmem:[%s3321_s27] sm:$0x1] }
 0x596   :  { %2559 = vmatprep.subr.msk.bf16.mxu0 %vm266_vm2, %v2890_v39  ;;  %v2596_v39 = vld [vmem:[%s3281_s15 + $0x8] sm:$0xff]  }
 0x59d   :  { %2417 = vmatpush3.bf16.xpose.msra.mxu0 %v2904_v40  ;;  %v1321_v40 = vpop.permute.xlu0 %1320 }
 0x59e   :  { %2560 = vmatprep.subr.msk.bf16.mxu0 %vm266_vm2, %v2909_v41  ;;  %v1326_v41 = vpop.permute.xlu1 %1325  ;;  %v1338_v31 = vmul.f32 %v3060_v9, %v1321_v40 }
 0x59f   :  { %v1339_v36 = vmul.f32 %v3060_v9, %v1326_v41 }
 0x5a2   :  { %v1336_v24 = vpop.permute.xlu1 %1335 }
 0x5a3   :  { %v1341_v33 = vmul.f32 %v3060_v9, %v1336_v24 }
 0x5a5   :  { %2419 = vmatpush3.bf16.xpose.msra.mxu0 %v2919_v42  ;;  %v1331_v42 = vpop.permute.xlu0 %1330 }
 0x5a6   :  { %2424 = vmatprep.subr.bf16.mxu0 %v1243_v11  ;;  %v1358_v28 = vpop.permute.xlu1 %1357  ;;  %v1340_v30 = vmul.f32 %v3060_v9, %v1331_v42 }
 0x5a9   :  { %v1353_v26 = vpop.permute.xlu0 %1352 }
 0x5aa   :  { %v1368_v22 = vpop.permute.xlu1 %1367 }
 0x5ac   :  { %2421 = vmatmul.mubr.msk.bf16.vlgmr.msra.gmra.mrb[24].mxu0 %vm266_vm2, %v1126_v2  ;;  %v2600_v2 = vld [vmem:[%s3284_s18 + $0x8] sm:$0xff]  }
 0x5ad   :  { %2425 = vmatpush3.bf16.msra.mxu0 %v1243_v11  ;;  %2428 = vmatprep.mubr.msk.bf16.mxu0 %vm440_vm3, %v2595_v14  ;;  %v1363_v37 = vpop.permute.xlu0 %1362 }
 0x5ae   :  { %2426 = vmatprep.subr.bf16.mxu0 %v1244_v38  ;;  %v1591_v4 = vpop.permute.xlu1 %1590 }
 0x5b1   :  { %2427 = vmatpush3.bf16.msra.mxu0 %v1244_v38 }
 0x5b2   :  { %v1601_v13 = vpop.permute.xlu1 %1600 }
 0x5b8   :  { %2429 = vmatmul.mubr.msk.bf16.vlgmr.msra.gmra.mrb[24].mxu0 %vm440_vm3, %v2596_v39 }
 0x68b   :  { %v2430_v32 = vpop.f32.mrb[24].mxu0 }
 0x68c   :  { %v1344_v34 = vadd.f32 %v2430_v32, %v1340_v30  ;;  %v1295_v35 = vpop.f32.mrb[25].mxu0 }
 0x68d   :  { %v1342_v43 = vadd.f32 %v1338_v31, %v1295_v35  ;;  %v2431_v44 = vpop.f32.mrb[26].mxu0  ;;  %v1686_v35 = vsel %vm786_vm4, %v1678_v7, 0 }
 0x68e   :  { %v1372_v45 = vadd.f32 %v1363_v37, %v1344_v34  ;;  %v1345_v46 = vadd.f32 %v2431_v44, %v1341_v33  ;;  %v1298_v47 = vpop.f32.mrb[27].mxu0 }
 0x68f   :  { %v1370_v48 = vadd.f32 %v1353_v26, %v1342_v43  ;;  %v1343_v49 = vadd.f32 %v1339_v36, %v1298_v47 }
 0x690   :  { %v1376_v50 = vmax.f32 %v1372_v45, 0.0  ;;  %v1373_v51 = vadd.f32 %v1368_v22, %v1345_v46 }
 0x691   :  { %v1374_v52 = vmax.f32 %v1370_v48, 0.0  ;;  %v1371_v20 = vadd.f32 %v1358_v28, %v1343_v49  ;;  %v2602_v49 = vld [vmem:[%s3288_s22 + $0x8] sm:$0xff]  }
 0x692   :  { %v1377_v53 = vmax.f32 %v1373_v51, 0.0  ;;  %v3170_v55 = vadd.f32 %v1376_v50, %v3066_v23  ;;  %v2597_v23 = vld [vmem:[%s3285_s19] sm:$0xff]   ;;  %v2604_v51 = vld [vmem:[%s3288_s22 + $0x18] sm:$0xff]  }
 0x693   :  { %v1375_v54 = vmax.f32 %v1371_v20, 0.0  ;;  %v1378_v12 = vadd.f32 %v1374_v52, %v3068_v25  ;;  %v2606_v20 = vld [vmem:[%s3287_s21 + $0x8] sm:$0xff]  }
 0x694   :  { %v3173_v9 = vadd.f32 %v1377_v53, %v3070_v27  ;;  %v1383_v56 = vpack.c.bf16 %v1377_v53, %v1376_v50  ;;  %v2603_v50 = vld [vmem:[%s3288_s22 + $0x10] sm:$0xff]  }
 0x695   :  { %v1379_v57 = vadd.f32 %v1375_v54, %v3072_v29  ;;  %v1382_v15 = vpack.c.bf16 %v1375_v54, %v1374_v52  ;;  %v2605_v52 = vld [vmem:[%s3287_s21] sm:$0xff]   ;;  %v2607_v53 = vld [vmem:[%s3287_s21 + $0x10] sm:$0xff]   ;;  %v2608_v54 = vld [vmem:[%s3287_s21 + $0x18] sm:$0xff]  }
 0x696   :  { %v1677_v16 = vpack.c.bf16 %v3173_v9, %v3170_v55  ;;  %v2634_v55 = vmov 0.0  }
 0x697   :  { %v1676_v17 = vpack.c.bf16 %v1379_v57, %v1378_v12  ;;  %2438 = vmatprep.mubr.msk.bf16.mxu1 %vm786_vm4, %v1382_v15  ;;  %2494 = vmatprep.subr.bf16.mxu0 %v2634_v55 }
 0x698   :  { %2439 = vmatmul.mubr.msk.bf16.vlgmr.msra.gmra.mrb[20].mxu1 %vm786_vm4, %v1383_v56  ;;  %2502 = vmatprep.mubr.msk.bf16.mxu0 %vm2635_vm5, %v2634_v55  ;;  %v1967_v56 = vpop.permute.xlu1 %1966 }
 0x699   :  { %2446 = vmatprep.mubr.msk.bf16.mxu1 %vm440_vm3, %v2597_v23 }
 0x69c   :  { %v1977_v57 = vpop.permute.xlu1 %1976 }
 0x76b   :  { %v2440_v27 = vpop.f32.mrb[20].mxu1 }
 0x76c   :  { %v1424_v18 = vpop.f32.mrb[21].mxu1 }
 0x76d   :  { %v2441_v25 = vpop.f32.mrb[22].mxu1 }
 0x76e   :  { %v1448_v19 = vpack.c.bf16 %v2441_v25, %v2440_v27  ;;  %v1427_v29 = vpop.f32.mrb[23].mxu1 }
 0x76f   :  { %v1447_v21 = vpack.c.bf16 %v1427_v29, %v1424_v18  ;;  %v1987_v29 = vpop.permute.xlu1 %1986 }
 0x771   :  { %2442 = vmatprep.subr.bf16.mxu1 %v1447_v21 }
 0x772   :  { %2443 = vmatpush3.bf16.msra.mxu1 %v1447_v21 }
 0x773   :  { %2444 = vmatprep.subr.bf16.mxu1 %v1448_v19 }
 0x776   :  { %2445 = vmatpush3.bf16.msra.mxu1 %v1448_v19 }
 0x777   :  { %2450 = vmatprep.subr.bf16.mxu1 %v3114_v62 }
 0x779   :  { %2447 = vmatmul.mubr.msk.bf16.vlgmr.msra.gmra.mrb[24].mxu1 %vm440_vm3, %v2598_v0 }
 0x77a   :  { %2451 = vmatpush3.bf16.msra.mxu1 %v3114_v62  ;;  %2454 = vmatprep.mubr.msk.bf16.mxu1 %vm440_vm3, %v2599_v1  ;;  %v1625_v62 = vsel %vm266_vm2, %v1617_v3, 0 }
 0x77b   :  { %2452 = vmatprep.subr.bf16.mxu1 %v3118_v63 }
 0x77e   :  { %2453 = vmatpush3.bf16.msra.mxu1 %v3118_v63  ;;  %v1586_v63 = vpop.permute.xlu0 %1585 }
 0x77f   :  { %2561 = vmatprep.subr.msk.bf16.mxu1 %vm266_vm2, %v1617_v3 }
 0x782   :  { %v1596_v5 = vpop.permute.xlu0 %1595 }
 0x785   :  { %2455 = vmatmul.mubr.msk.bf16.vlgmr.msra.gmra.mrb[24].mxu1 %vm440_vm3, %v2600_v2 }
 0x786   :  { %v1962_v9 = vpop.permute.xlu0 %1961 }
 0x787   :  { %2459 = vmatpush3.bf16.xpose.msra.mxu1 %v1625_v62 }
 0x788   :  { %2562 = vmatprep.subr.msk.bf16.mxu1 %vm786_vm4, %v1678_v7 }
 0x78a   :  { %v1972_v12 = vpop.permute.xlu0 %1971 }
 0x78e   :  { %v1982_v23 = vpop.permute.xlu0 %1981 }
 0x792   :  { %v1992_v7 = vpop.permute.xlu0 %1991 }
 0x858   :  { %v2456_v6 = vpop.f32.mrb[24].mxu1 }
 0x859   :  { %v1605_v8 = vadd.f32 %v2456_v6, %v1596_v5  ;;  %v1564_v10 = vpop.f32.mrb[25].mxu1 }
 0x85a   :  { %v1603_v11 = vadd.f32 %v1586_v63, %v1564_v10  ;;  %v2457_v14 = vpop.f32.mrb[26].mxu1 }
 0x85b   :  { %v1609_v38 = vmax.f32 %v1605_v8, 0.0  ;;  %v1606_v39 = vadd.f32 %v2457_v14, %v1601_v13  ;;  %v1567_v40 = vpop.f32.mrb[27].mxu1  ;;  %v1997_v8 = vpop.permute.xlu1 %1996 }
 0x85c   :  { %v1607_v41 = vmax.f32 %v1603_v11, 0.0  ;;  %v1604_v42 = vadd.f32 %v1591_v4, %v1567_v40 }
 0x85d   :  { %v1610_v24 = vmax.f32 %v1606_v39, 0.0  ;;  %v1613_v28 = vadd.f32 %v1609_v38, %v3101_v58  ;;  %v2601_v58 = vld [vmem:[%s3288_s22] sm:$0xff]  }
 0x85e   :  { %v1608_v26 = vmax.f32 %v1604_v42, 0.0  ;;  %v1611_v31 = vadd.f32 %v1607_v41, %v3104_v59 }
 0x85f   :  { %v1614_v30 = vadd.f32 %v1610_v24, %v3107_v60 }
 0x860   :  { %v1612_v32 = vadd.f32 %v1608_v26, %v3110_v61 }
 0x861   :  { %v1616_v33 = vpack.c.bf16 %v1614_v30, %v1613_v28  ;;  %v2015_v28 = vld [vmem:[%s3290_s24] sm:$0x1]  ;;  %v2026_v30 = vlaneseq  ;;  %s2613_s24 = scalar_lea.vmem %s2083_s25, 32 }
 0x862   :  { %v1615_v34 = vpack.c.bf16 %v1612_v32, %v1611_v31  ;;  %p2615_p2 = scmp.lt.s32.totalorder %s2613_s24, %s2609_s13 }
 0x863   :  { %v2027_v31 = vshrl.u32 %v2026_v30, 7 }
 0x864   :  { %2460 = vmatprep.mubr.msk.bf16.mxu1 %vm266_vm2, %v1615_v34  ;;  %p2616_p3 = por %p2615_p2, %p2614_p1 }
 0x865   :  { %2461 = vmatmul.mubr.msk.bf16.vlgmr.msra.gmra.mrb[28].mxu1 %vm266_vm2, %v1616_v33  ;;  %v2028_v32 = vsub.s32 0, %v2027_v31  ;;  %v2024_v33 = vpop.permute.xlu0 %2023 }
 0x866   :  { %2465 = vmatpush3.bf16.xpose.msra.mxu1 %v1686_v35  ;;  %2466 = vmatprep.mubr.msk.bf16.mxu1 %vm786_vm4, %v1676_v17  ;;  %p2617_p4 = pnand %p2616_p3, %p2610_p0 }
 0x867   :  { %v2029_v34 = vrot.slane %v2024_v33, %v2028_v32 }
 0x86d   :  { %2467 = vmatmul.mubr.msk.bf16.vlgmr.msra.gmra.mrb[32].mxu1 %vm786_vm4, %v1677_v16 }
 0x86e   :  { %2474 = vmatprep.mubr.msk.bf16.mxu1 %vm440_vm3, %v2601_v58 }
 0x938   :  { %v2462_v59 = vpop.f32.mrb[28].mxu1 }
 0x939   :  { %v1661_v60 = vpop.f32.mrb[29].mxu1 }
 0x93a   :  { %v2463_v61 = vpop.f32.mrb[30].mxu1 }
 0x93b   :  { %v1746_v36 = vpack.c.bf16 %v2463_v61, %v2462_v59  ;;  %v1664_v37 = vpop.f32.mrb[31].mxu1 }
 0x93c   :  { %v1745_v43 = vpack.c.bf16 %v1664_v37, %v1661_v60 }
 0x940   :  { %v2468_v44 = vpop.f32.mrb[32].mxu1 }
 0x941   :  { %v1722_v45 = vpop.f32.mrb[33].mxu1 }
 0x942   :  { %v2469_v46 = vpop.f32.mrb[34].mxu1 }
 0x943   :  { %v1756_v47 = vpack.c.bf16 %v2469_v46, %v2468_v44  ;;  %v1725_v22 = vpop.f32.mrb[35].mxu1 }
 0x944   :  { %v1755_v48 = vpack.c.bf16 %v1725_v22, %v1722_v45 }
 0x946   :  { %2470 = vmatprep.subr.bf16.mxu1 %v1755_v48 }
 0x947   :  { %2471 = vmatpush3.bf16.msra.mxu1 %v1755_v48 }
 0x948   :  { %2472 = vmatprep.subr.bf16.mxu1 %v1756_v47 }
 0x94b   :  { %2473 = vmatpush3.bf16.msra.mxu1 %v1756_v47 }
 0x94c   :  { %2482 = vmatprep.subr.bf16.mxu1 %v1745_v43 }
 0x94e   :  { %2475 = vmatmul.mubr.msk.bf16.vlgmr.msra.gmra.mrb[36].mxu1 %vm440_vm3, %v2602_v49 }
 0x94f   :  { %2483 = vmatpush3.bf16.msra.mxu1 %v1745_v43  ;;  %2478 = vmatprep.mubr.msk.bf16.mxu1 %vm440_vm3, %v2603_v50 }
 0x950   :  { %2484 = vmatprep.subr.bf16.mxu1 %v1746_v36 }
 0x953   :  { %2485 = vmatpush3.bf16.msra.mxu1 %v1746_v36 }
 0x956   :  { %2479 = vmatmul.mubr.msk.bf16.gmra.mrb[40].mxu1 %vm440_vm3, %v2604_v51 }
 0x957   :  { %2486 = vmatprep.mubr.msk.bf16.mxu1 %vm440_vm3, %v2605_v52 }
 0x95e   :  { %2487 = vmatmul.mubr.msk.bf16.vlgmr.msra.gmra.mrb[36].mxu1 %vm440_vm3, %v2606_v20 }
 0x95f   :  { %2490 = vmatprep.mubr.msk.bf16.mxu1 %vm440_vm3, %v2607_v53 }
 0x966   :  { %2491 = vmatmul.mubr.msk.bf16.gmra.mrb[40].mxu1 %vm440_vm3, %v2608_v54 }
 0xa31   :  { %v2488_v15 = vpop.f32.mrb[36].mxu1 }
 0xa32   :  { %v2001_v16 = vadd.f32 %v2488_v15, %v1972_v12  ;;  %v1920_v17 = vpop.f32.mrb[37].mxu1 }
 0xa33   :  { %v1999_v27 = vadd.f32 %v1962_v9, %v1920_v17  ;;  %v2489_v18 = vpop.f32.mrb[38].mxu1 }
 0xa34   :  { %v2002_v25 = vadd.f32 %v2489_v18, %v1977_v57  ;;  %v1923_v19 = vpop.f32.mrb[39].mxu1  ;;  %v2009_v0 = vmax.f32 %v2001_v16, 0.0 }
 0xa35   :  { %v2000_v21 = vadd.f32 %v1967_v56, %v1923_v19  ;;  %v2007_v2 = vmax.f32 %v1999_v27, 0.0 }
 0xa36   :  { %v2010_v1 = vmax.f32 %v2002_v25, 0.0 }
 0xa37   :  { %v2008_v3 = vmax.f32 %v2000_v21, 0.0 }
 0xa38   :  { %v2017_v62 = vpack.c.bf16 %v2010_v1, %v2009_v0 }
 0xa39   :  { %v2016_v63 = vpack.c.bf16 %v2008_v3, %v2007_v2  ;;  %v2492_v4 = vpop.f32.mrb[40].mxu1 }
 0xa3a   :  { %v2005_v5 = vadd.f32 %v2492_v4, %v1992_v7  ;;  %v1936_v6 = vpop.f32.mrb[41].mxu1 }
 0xa3b   :  { %v2003_v10 = vadd.f32 %v1982_v23, %v1936_v6  ;;  %v2493_v13 = vpop.f32.mrb[42].mxu1  ;;  %2495 = vmatpush3.bf16.msra.mxu0 %v2016_v63 }
 0xa3c   :  { %v2006_v11 = vadd.f32 %v2493_v13, %v1997_v8  ;;  %v1939_v14 = vpop.f32.mrb[43].mxu1  ;;  %2496 = vmatprep.subr.bf16.mxu0 %v2634_v55  ;;  %v2013_v39 = vmax.f32 %v2005_v5, 0.0 }
 0xa3d   :  { %v2004_v38 = vadd.f32 %v1987_v29, %v1939_v14  ;;  %v2011_v41 = vmax.f32 %v2003_v10, 0.0 }
 0xa3e   :  { %v2014_v40 = vmax.f32 %v2006_v11, 0.0 }
 0xa3f   :  { %v2012_v42 = vmax.f32 %v2004_v38, 0.0  ;;  %2497 = vmatpush3.bf16.msra.mxu0 %v2017_v62 }
 0xa40   :  { %v2019_v24 = vpack.c.bf16 %v2014_v40, %v2013_v39  ;;  %2498 = vmatprep.subr.bf16.mxu0 %v2634_v55 }
 0xa41   :  { %v2018_v26 = vpack.c.bf16 %v2012_v42, %v2011_v41 }
 0xa43   :  { %2499 = vmatpush3.bf16.msra.mxu0 %v2018_v26 }
 0xa44   :  { %2500 = vmatprep.subr.bf16.mxu0 %v2634_v55 }
 0xa47   :  { %2501 = vmatpush3.bf16.msra.mxu0 %v2019_v24 }
 0xa4a   :  { %2503 = vmatmul.mubr.msk.bf16.vlgmr.msra.gmra.mrb[28].mxu0 %vm2030_vm6, %v2015_v28 }
 0xb1d   :  { %v2068_v35 = vpop.f32.mrb[28].mxu0 }
 0xb1e   :  { %v2069_v58 = vadd.f32 %v2068_v35, %v2029_v34  ;;  %v2504_v59 = vpop.f32.mrb[29].mxu0 }
 0xb1f   :  { %v2071_v60 = vpop.f32.mrb[30].mxu0 }
 0xb20   :  { %v2505_v61 = vpop.f32.mrb[31].mxu0  ;;  %2075 = vst.msk [vmem:[#allocation3] sm:$0x1] %vm2074_vm7, %v2069_v58 }
 0xb21   :  { %2620 = shalt.err (!%p2617_p4)
}
 0xb22   :  { %s2621_s19 = scalar_lea.hbm %s3292_s26, 16 }
 0xb23   :  { %p2622_p5 = scmp.ne.s32.totalorder %s3292_s26, %s2621_s19  ;;  %p2625_p6 = scmp.lt.u32.totalorder %s2621_s19, %s3292_s26 }
 0xb25   :  { %p2627_p7 = pnand %p2625_p6, %p2622_p5 }
 0xb27   :  { %2630 = shalt.err (!%p2627_p7)
}
 0xb28   :  { %2085 = dma.vmem_to_hbm [thread:$0]  %s2083_s25, 16, %s3292_s26, [#allocation4]  }
 0xb29   :  { %2631 = dma.done.wait [#allocation4], 16  }
 0xb2a   :  { %2632 = vsyncadd [#allocation4], 4294967280 }
 0xb2b   :  { %2089 = vsyncpa [#allocation4], 1 }

</bundles_post_ra>
